<compile_context>
chip_gen: v6e
topology: v6e:2x2x1
jax: 0.10.0
libtpu: 0.0.40
codegen_flags: <defaults>
</compile_context>

<pallas_src>
import functools

import numpy as np
import jax
import jax.numpy as jnp
from jax import lax
from jax.experimental import pallas as pl
from jax.experimental.pallas import tpu as pltpu

NEG_SLOPE = 0.20   # net_utils.activation_func('leaky_relu') -> LeakyReLU(0.20)
POSE_SCALE = 0.01  # dof = 0.01 * mean(conv_output, spatial)


def _conv_out(n, k=3, s=2, p=1):
    return (n + 2 * p - k) // s + 1


# ------------------------------- Pallas kernel -------------------------------

def _pose_decoder_kernel(*refs, n_conv, dims, spatial_last):
    """Fused PoseDecoder trunk; one batch sample per grid step.

    refs layout:
      x_ref                     [(H0+2)*(W0+2), C0]  f32  padded, flattened NHWC sample
      w_ref_0 .. w_ref_{n-1}    [9*Cin_l, Cout_l]    f32  conv weights, tap-major rows
      w_head_ref                [C_last, 6]          f32  1x1 head weights
      dof_ref                   [1, 6]               f32  out: 0.01 * (spatial mean @ head)
      act_ref_1 .. act_{n-1}    [(Hl+2)*(Wl+2), Cl]  f32  scratch: padded input of conv l
      patch_ref_0 .. patch_{n-1}[Hol*Wol, 9*Cin_l]   f32  scratch: im2col patch of conv l

    dims[l] = (Hp, Wp, Ho, Wo, Cin, Cout) of conv layer l (all static Python ints).
    """
    x_ref = refs[0]
    w_refs = refs[1:1 + n_conv]
    w_head_ref = refs[1 + n_conv]
    dof_ref = refs[2 + n_conv]
    n_act = max(n_conv - 1, 0)
    act_refs = refs[3 + n_conv:3 + n_conv + n_act]
    patch_refs = refs[3 + n_conv + n_act:]

    src = x_ref
    last = x_ref[...] if n_conv == 0 else None

    for l in range(n_conv):
        _, wp, ho, wo, cin, cout = dims[l]
        patch_ref = patch_refs[l]

        # ---- im2col patch assembly: static strided loads, no index tables ----
        # For output row r and tap (di, dj), the inputs are the padded rows
        # (2r+di)*wp + dj + 2*{0..wo-1}: one sublane-strided load per (r, tap).
        for r in range(ho):
            for t in range(9):
                di, dj = t // 3, t % 3
                base = (2 * r + di) * wp + dj
                patch_ref[r * wo:(r + 1) * wo, t * cin:(t + 1) * cin] = (
                    src[pl.ds(base, wo, stride=2), :])

        # ---- one fused MXU matmul per layer: K = 9*Cin ------------------------
        z = jnp.dot(patch_ref[...], w_refs[l][...],
                    preferred_element_type=jnp.float32)          # [ho*wo, cout]
        act = jnp.where(z >= 0.0, z, NEG_SLOPE * z)               # LeakyReLU(0.20)

        if l + 1 < n_conv:
            # Write into the next layer's zero-padded activation scratch
            # (border rows/cols stay zero == conv padding).
            dst = act_refs[l]
            dst[...] = jnp.zeros_like(dst)
            wp_next = wo + 2
            for r in range(ho):
                row0 = (r + 1) * wp_next + 1
                dst[row0:row0 + wo, :] = act[r * wo:(r + 1) * wo, :]
            src = dst
        else:
            last = act

    # Spatial mean BEFORE the bias-free 1x1 head (mathematically identical),
    # then a single [1, C_last] x [C_last, 6] matmul and one [1, 6] store.
    mean = jnp.sum(last, axis=0, keepdims=True) * (1.0 / float(spatial_last))
    dof_ref[...] = POSE_SCALE * jnp.dot(mean, w_head_ref[...],
                                        preferred_element_type=jnp.float32)


# ----------------------------- host-side plumbing -----------------------------

def _conv_w_to_mat(w):
    # PyTorch layout [Cout, Cin, kh, kw] -> [kh*kw*Cin, Cout], tap-major rows
    # (tap t = kh*3 + kw, matching the kernel's patch column blocks).
    co, ci, kh, kw = w.shape
    return jnp.transpose(w, (2, 3, 1, 0)).reshape(kh * kw * ci, co).astype(jnp.float32)


# ------------------------------ pose 4x4 epilogue ------------------------------

def _pose_matrix(dof):
    """net_utils.pose_matrix(dof, 'axis'): [B, 6] -> [B, 4, 4] (T @ R)."""
    rvec = dof[:, :3]
    tvec = dof[:, 3:]
    angle = jnp.sqrt(jnp.sum(rvec * rvec, axis=1, keepdims=True))   # [B, 1]
    axis = rvec / (angle + 1e-7)
    ca = jnp.cos(angle)[:, 0]
    sa = jnp.sin(angle)[:, 0]
    c1 = 1.0 - ca
    x, y, z = axis[:, 0], axis[:, 1], axis[:, 2]
    xs, ys, zs = x * sa, y * sa, z * sa
    xC, yC, zC = x * c1, y * c1, z * c1
    xyC, yzC, zxC = x * yC, y * zC, z * xC
    rot = jnp.stack([
        jnp.stack([x * xC + ca, xyC - zs, zxC + ys], axis=-1),
        jnp.stack([xyC + zs, y * yC + ca, yzC - xs], axis=-1),
        jnp.stack([zxC - ys, yzC + xs, z * zC + ca], axis=-1),
    ], axis=1)                                                      # [B, 3, 3]
    top = jnp.concatenate([rot, tvec[:, :, None]], axis=2)          # [B, 3, 4]
    bottom = jnp.tile(jnp.array([[[0.0, 0.0, 0.0, 1.0]]], jnp.float32),
                      (dof.shape[0], 1, 1))
    return jnp.concatenate([top, bottom], axis=1)                   # [B, 4, 4]


# -------------------------------- forward pass --------------------------------

def pose_decoder_forward(params, x_nchw, rotation_parameterization="axis"):
    assert rotation_parameterization == "axis"
    bsz, c0, h0, w0 = x_nchw.shape
    n_conv = len(params["convs"])

    # Static layer geometry + weight matrices.
    dims = []
    w_mats = []
    h, w, cin = h0, w0, c0
    for wconv in params["convs"]:
        cout = wconv.shape[0]
        ho, wo = _conv_out(h), _conv_out(w)
        dims.append((h + 2, w + 2, ho, wo, cin, cout))
        w_mats.append(_conv_w_to_mat(wconv))
        h, w, cin = ho, wo, cout
    spatial_last = h * w
    w_head = jnp.transpose(params["conv_head"][:, :, 0, 0]).astype(jnp.float32)  # [C_last, 6]

    # NCHW -> NHWC once at the boundary (layout plumbing); zero-pad spatially
    # (pad=1) and flatten rows so every in-kernel access is a static slice.
    xt = jnp.transpose(x_nchw, (0, 2, 3, 1)).astype(jnp.float32)
    if n_conv > 0:
        xt = jnp.pad(xt, ((0, 0), (1, 1), (1, 1), (0, 0)))
        s0 = (h0 + 2) * (w0 + 2)
    else:
        s0 = h0 * w0
    x_rows = xt.reshape(bsz, s0, c0)

    in_specs = [pl.BlockSpec((None, s0, c0), lambda b: (b, 0, 0))]
    in_specs += [pl.BlockSpec(wm.shape, lambda b: (0, 0)) for wm in w_mats]
    in_specs += [pl.BlockSpec(w_head.shape, lambda b: (0, 0))]
    out_spec = pl.BlockSpec((None, 1, 6), lambda b: (b, 0, 0))

    scratch = []
    for l in range(1, n_conv):            # padded input storage of conv l
        hp, wp, _, _, cin_l, _ = dims[l]
        scratch.append(pltpu.VMEM((hp * wp, cin_l), jnp.float32))
    for l in range(n_conv):               # im2col patch of conv l
        _, _, ho, wo, cin_l, _ = dims[l]
        scratch.append(pltpu.VMEM((ho * wo, 9 * cin_l), jnp.float32))

    kernel = functools.partial(_pose_decoder_kernel, n_conv=n_conv,
                               dims=tuple(dims), spatial_last=spatial_last)

    dof = pl.pallas_call(
        kernel,
        grid=(bsz,),
        in_specs=in_specs,
        out_specs=out_spec,
        out_shape=jax.ShapeDtypeStruct((bsz, 1, 6), jnp.float32),
        scratch_shapes=scratch,
        compiler_params=pltpu.CompilerParams(
            # One sample per grid step; "parallel" lets v7x's 2 TensorCores
            # each take a disjoint batch slice (neutral on v5e/v6e).
            dimension_semantics=("parallel",),
            # Actual VMEM need here is < 1 MiB; set an explicit budget that is
            # safe on all generations (<= physical on v7x, <= default-ish).
            vmem_limit_bytes=32 * 1024 * 1024),
    )(x_rows, *w_mats, w_head)

    # TODO(synk): the 4x4 Rodrigues/translation assembly (a few dozen flops per
    # sample, sin/cos + per-element layout) stays as a plain-JAX epilogue.
    return _pose_matrix(dof[:, 0, :])


# ------------------------------ parameter init --------------------------------

def _kaiming_uniform(key, shape):
    # shape: [Cout, Cin, kh, kw]
    fan_in = shape[1] * shape[2] * shape[3]
    bound = float(np.sqrt(6.0 / fan_in))
    return jax.random.uniform(key, shape, jnp.float32, -bound, bound)


def init_params(key, input_channels, n_filters):
    # TODO(synk): exact PyTorch kaiming_uniform RNG sequence not reproduced;
    # shapes/layout match, values are deterministic from the given PRNGKey.
    keys = jax.random.split(key, len(n_filters) + 1)
    convs = []
    in_ch = input_channels
    for i, out_ch in enumerate(n_filters):
        convs.append(_kaiming_uniform(keys[i], (out_ch, in_ch, 3, 3)))
        in_ch = out_ch
    conv_head = _kaiming_uniform(keys[-1], (6, in_ch, 1, 1))
    return {"convs": convs, "conv_head": conv_head}


# ------------------------------ plain-JAX reference ----------------------------

def _reference_dof(params, x):
    """XLA-conv f32 reference of the decoder trunk."""
    h = x.astype(jnp.float32)
    dn = ("NCHW", "OIHW", "NCHW")
    for wconv in params["convs"]:
        h = lax.conv_general_dilated(h, wconv, (2, 2), ((1, 1), (1, 1)),
                                     dimension_numbers=dn,
                                     precision=lax.Precision.HIGHEST)
        h = jnp.where(h >= 0.0, h, NEG_SLOPE * h)
    h = lax.conv_general_dilated(h, params["conv_head"], (1, 1), ((0, 0), (0, 0)),
                                 dimension_numbers=dn,
                                 precision=lax.Precision.HIGHEST)
    return POSE_SCALE * jnp.mean(h, axis=(2, 3))


# ------------------------------------ main -------------------------------------

if __name__ == "__main__":
    key = jax.random.PRNGKey(0)
    k_params, k_x = jax.random.split(key)

    batch, input_channels, height, width = 2, 32, 16, 16
    n_filters = [32, 32]   # small PoseDecoder: two 3x3/s2 convs + 1x1 head

    params = init_params(k_params, input_channels, n_filters)
    x = jax.random.normal(k_x, (batch, input_channels, height, width), jnp.float32)

    posemat = jax.jit(pose_decoder_forward)(params, x)
    posemat = jax.block_until_ready(posemat)

    assert posemat.shape == (batch, 4, 4)
    assert bool(jnp.all(jnp.isfinite(posemat)))

    # Numerical sanity vs. an f32 XLA-conv reference of the same trunk.
    ref_posemat = _pose_matrix(_reference_dof(params, x))
    assert bool(jnp.allclose(posemat, ref_posemat, atol=5e-4, rtol=0.0)), \
        "kernel output mismatch vs reference"

    print("KERNEL_OK")
</pallas_src>

<mosaic_0001>
module attributes {stable_mosaic.version = 11 : i64} {
  func.func @_pose_decoder_kernel(%arg0: i32, %arg1: memref<1x324x32xf32, #tpu.memory_space<vmem>>, %arg2: memref<288x32xf32, #tpu.memory_space<vmem>>, %arg3: memref<288x32xf32, #tpu.memory_space<vmem>>, %arg4: memref<32x6xf32, #tpu.memory_space<vmem>>, %arg5: memref<1x1x6xf32, #tpu.memory_space<vmem>>, %arg6: memref<100x32xf32, #tpu.memory_space<vmem>>, %arg7: memref<64x288xf32, #tpu.memory_space<vmem>>, %arg8: memref<16x288xf32, #tpu.memory_space<vmem>>) attributes {dimension_semantics = [#tpu.dimension_semantics<parallel>], iteration_bounds = array<i64: 2>, scalar_prefetch = 0 : i64, scratch_operands = 3 : i64, tpu.core_type = #tpu.core_type<tc>, window_params = [{transform_indices = @transform_0, window_bounds = array<i64: 1, 324, 32>}, {pipeline_mode = #tpu.pipeline_mode<synchronous>, transform_indices = @transform_1, window_bounds = array<i64: 288, 32>}, {pipeline_mode = #tpu.pipeline_mode<synchronous>, transform_indices = @transform_2, window_bounds = array<i64: 288, 32>}, {pipeline_mode = #tpu.pipeline_mode<synchronous>, transform_indices = @transform_3, window_bounds = array<i64: 32, 6>}, {transform_indices = @transform_4, window_bounds = array<i64: 1, 1, 6>}]} {
    %c0 = arith.constant 0 : index
    %c0_0 = arith.constant 0 : index
    %c0_1 = arith.constant 0 : index
    %0 = tpu.strided_load %arg1[%c0, %c0_0, %c0_1] {strides = array<i32: 1, 2, 1>} : memref<1x324x32xf32, #tpu.memory_space<vmem>>, vector<1x8x32xf32>
    %1 = vector.shape_cast %0 : vector<1x8x32xf32> to vector<8x32xf32>
    %c0_2 = arith.constant 0 : index
    %c0_3 = arith.constant 0 : index
    %2 = vector.load %arg7[%c0_2, %c0_3] : memref<64x288xf32, #tpu.memory_space<vmem>>, vector<8x32xf32>
    tpu.vector_store %arg7[%c0_2, %c0_3], %1 {strides = array<i32>} : memref<64x288xf32, #tpu.memory_space<vmem>>, vector<8x32xf32>,
    %c0_4 = arith.constant 0 : index
    %c1 = arith.constant 1 : index
    %c0_5 = arith.constant 0 : index
    %3 = tpu.strided_load %arg1[%c0_4, %c1, %c0_5] {strides = array<i32: 1, 2, 1>} : memref<1x324x32xf32, #tpu.memory_space<vmem>>, vector<1x8x32xf32>
    %4 = vector.shape_cast %3 : vector<1x8x32xf32> to vector<8x32xf32>
    %c0_6 = arith.constant 0 : index
    %c32 = arith.constant 32 : index
    %5 = vector.load %arg7[%c0_6, %c32] : memref<64x288xf32, #tpu.memory_space<vmem>>, vector<8x32xf32>
    tpu.vector_store %arg7[%c0_6, %c32], %4 {strides = array<i32>} : memref<64x288xf32, #tpu.memory_space<vmem>>, vector<8x32xf32>,
    %c0_7 = arith.constant 0 : index
    %c2 = arith.constant 2 : index
    %c0_8 = arith.constant 0 : index
    %6 = tpu.strided_load %arg1[%c0_7, %c2, %c0_8] {strides = array<i32: 1, 2, 1>} : memref<1x324x32xf32, #tpu.memory_space<vmem>>, vector<1x8x32xf32>
    %7 = vector.shape_cast %6 : vector<1x8x32xf32> to vector<8x32xf32>
    %c0_9 = arith.constant 0 : index
    %c64 = arith.constant 64 : index
    %8 = vector.load %arg7[%c0_9, %c64] : memref<64x288xf32, #tpu.memory_space<vmem>>, vector<8x32xf32>
    tpu.vector_store %arg7[%c0_9, %c64], %7 {strides = array<i32>} : memref<64x288xf32, #tpu.memory_space<vmem>>, vector<8x32xf32>,
    %c0_10 = arith.constant 0 : index
    %c18 = arith.constant 18 : index
    %c0_11 = arith.constant 0 : index
    %9 = tpu.strided_load %arg1[%c0_10, %c18, %c0_11] {strides = array<i32: 1, 2, 1>} : memref<1x324x32xf32, #tpu.memory_space<vmem>>, vector<1x8x32xf32>
    %10 = vector.shape_cast %9 : vector<1x8x32xf32> to vector<8x32xf32>
    %c0_12 = arith.constant 0 : index
    %c96 = arith.constant 96 : index
    %11 = vector.load %arg7[%c0_12, %c96] : memref<64x288xf32, #tpu.memory_space<vmem>>, vector<8x32xf32>
    tpu.vector_store %arg7[%c0_12, %c96], %10 {strides = array<i32>} : memref<64x288xf32, #tpu.memory_space<vmem>>, vector<8x32xf32>,
    %c0_13 = arith.constant 0 : index
    %c19 = arith.constant 19 : index
    %c0_14 = arith.constant 0 : index
    %12 = tpu.strided_load %arg1[%c0_13, %c19, %c0_14] {strides = array<i32: 1, 2, 1>} : memref<1x324x32xf32, #tpu.memory_space<vmem>>, vector<1x8x32xf32>
    %13 = vector.shape_cast %12 : vector<1x8x32xf32> to vector<8x32xf32>
    %c0_15 = arith.constant 0 : index
    %c128 = arith.constant 128 : index
    %14 = vector.load %arg7[%c0_15, %c128] : memref<64x288xf32, #tpu.memory_space<vmem>>, vector<8x32xf32>
    tpu.vector_store %arg7[%c0_15, %c128], %13 {strides = array<i32>} : memref<64x288xf32, #tpu.memory_space<vmem>>, vector<8x32xf32>,
    %c0_16 = arith.constant 0 : index
    %c20 = arith.constant 20 : index
    %c0_17 = arith.constant 0 : index
    %15 = tpu.strided_load %arg1[%c0_16, %c20, %c0_17] {strides = array<i32: 1, 2, 1>} : memref<1x324x32xf32, #tpu.memory_space<vmem>>, vector<1x8x32xf32>
    %16 = vector.shape_cast %15 : vector<1x8x32xf32> to vector<8x32xf32>
    %c0_18 = arith.constant 0 : index
    %c160 = arith.constant 160 : index
    %17 = vector.load %arg7[%c0_18, %c160] : memref<64x288xf32, #tpu.memory_space<vmem>>, vector<8x32xf32>
    tpu.vector_store %arg7[%c0_18, %c160], %16 {strides = array<i32>} : memref<64x288xf32, #tpu.memory_space<vmem>>, vector<8x32xf32>,
    %c0_19 = arith.constant 0 : index
    %c36 = arith.constant 36 : index
    %c0_20 = arith.constant 0 : index
    %18 = tpu.strided_load %arg1[%c0_19, %c36, %c0_20] {strides = array<i32: 1, 2, 1>} : memref<1x324x32xf32, #tpu.memory_space<vmem>>, vector<1x8x32xf32>
    %19 = vector.shape_cast %18 : vector<1x8x32xf32> to vector<8x32xf32>
    %c0_21 = arith.constant 0 : index
    %c192 = arith.constant 192 : index
    %20 = vector.load %arg7[%c0_21, %c192] : memref<64x288xf32, #tpu.memory_space<vmem>>, vector<8x32xf32>
    tpu.vector_store %arg7[%c0_21, %c192], %19 {strides = array<i32>} : memref<64x288xf32, #tpu.memory_space<vmem>>, vector<8x32xf32>,
    %c0_22 = arith.constant 0 : index
    %c37 = arith.constant 37 : index
    %c0_23 = arith.constant 0 : index
    %21 = tpu.strided_load %arg1[%c0_22, %c37, %c0_23] {strides = array<i32: 1, 2, 1>} : memref<1x324x32xf32, #tpu.memory_space<vmem>>, vector<1x8x32xf32>
    %22 = vector.shape_cast %21 : vector<1x8x32xf32> to vector<8x32xf32>
    %c0_24 = arith.constant 0 : index
    %c224 = arith.constant 224 : index
    %23 = vector.load %arg7[%c0_24, %c224] : memref<64x288xf32, #tpu.memory_space<vmem>>, vector<8x32xf32>
    tpu.vector_store %arg7[%c0_24, %c224], %22 {strides = array<i32>} : memref<64x288xf32, #tpu.memory_space<vmem>>, vector<8x32xf32>,
    %c0_25 = arith.constant 0 : index
    %c38 = arith.constant 38 : index
    %c0_26 = arith.constant 0 : index
    %24 = tpu.strided_load %arg1[%c0_25, %c38, %c0_26] {strides = array<i32: 1, 2, 1>} : memref<1x324x32xf32, #tpu.memory_space<vmem>>, vector<1x8x32xf32>
    %25 = vector.shape_cast %24 : vector<1x8x32xf32> to vector<8x32xf32>
    %c0_27 = arith.constant 0 : index
    %c256 = arith.constant 256 : index
    %26 = vector.load %arg7[%c0_27, %c256] : memref<64x288xf32, #tpu.memory_space<vmem>>, vector<8x32xf32>
    tpu.vector_store %arg7[%c0_27, %c256], %25 {strides = array<i32>} : memref<64x288xf32, #tpu.memory_space<vmem>>, vector<8x32xf32>,
    %c0_28 = arith.constant 0 : index
    %c36_29 = arith.constant 36 : index
    %c0_30 = arith.constant 0 : index
    %27 = tpu.strided_load %arg1[%c0_28, %c36_29, %c0_30] {strides = array<i32: 1, 2, 1>} : memref<1x324x32xf32, #tpu.memory_space<vmem>>, vector<1x8x32xf32>
    %28 = vector.shape_cast %27 : vector<1x8x32xf32> to vector<8x32xf32>
    %c8 = arith.constant 8 : index
    %c0_31 = arith.constant 0 : index
    %29 = vector.load %arg7[%c8, %c0_31] : memref<64x288xf32, #tpu.memory_space<vmem>>, vector<8x32xf32>
    tpu.vector_store %arg7[%c8, %c0_31], %28 {strides = array<i32>} : memref<64x288xf32, #tpu.memory_space<vmem>>, vector<8x32xf32>,
    %c0_32 = arith.constant 0 : index
    %c37_33 = arith.constant 37 : index
    %c0_34 = arith.constant 0 : index
    %30 = tpu.strided_load %arg1[%c0_32, %c37_33, %c0_34] {strides = array<i32: 1, 2, 1>} : memref<1x324x32xf32, #tpu.memory_space<vmem>>, vector<1x8x32xf32>
    %31 = vector.shape_cast %30 : vector<1x8x32xf32> to vector<8x32xf32>
    %c8_35 = arith.constant 8 : index
    %c32_36 = arith.constant 32 : index
    %32 = vector.load %arg7[%c8_35, %c32_36] : memref<64x288xf32, #tpu.memory_space<vmem>>, vector<8x32xf32>
    tpu.vector_store %arg7[%c8_35, %c32_36], %31 {strides = array<i32>} : memref<64x288xf32, #tpu.memory_space<vmem>>, vector<8x32xf32>,
    %c0_37 = arith.constant 0 : index
    %c38_38 = arith.constant 38 : index
    %c0_39 = arith.constant 0 : index
    %33 = tpu.strided_load %arg1[%c0_37, %c38_38, %c0_39] {strides = array<i32: 1, 2, 1>} : memref<1x324x32xf32, #tpu.memory_space<vmem>>, vector<1x8x32xf32>
    %34 = vector.shape_cast %33 : vector<1x8x32xf32> to vector<8x32xf32>
    %c8_40 = arith.constant 8 : index
    %c64_41 = arith.constant 64 : index
    %35 = vector.load %arg7[%c8_40, %c64_41] : memref<64x288xf32, #tpu.memory_space<vmem>>, vector<8x32xf32>
    tpu.vector_store %arg7[%c8_40, %c64_41], %34 {strides = array<i32>} : memref<64x288xf32, #tpu.memory_space<vmem>>, vector<8x32xf32>,
    %c0_42 = arith.constant 0 : index
    %c54 = arith.constant 54 : index
    %c0_43 = arith.constant 0 : index
    %36 = tpu.strided_load %arg1[%c0_42, %c54, %c0_43] {strides = array<i32: 1, 2, 1>} : memref<1x324x32xf32, #tpu.memory_space<vmem>>, vector<1x8x32xf32>
    %37 = vector.shape_cast %36 : vector<1x8x32xf32> to vector<8x32xf32>
    %c8_44 = arith.constant 8 : index
    %c96_45 = arith.constant 96 : index
    %38 = vector.load %arg7[%c8_44, %c96_45] : memref<64x288xf32, #tpu.memory_space<vmem>>, vector<8x32xf32>
    tpu.vector_store %arg7[%c8_44, %c96_45], %37 {strides = array<i32>} : memref<64x288xf32, #tpu.memory_space<vmem>>, vector<8x32xf32>,
    %c0_46 = arith.constant 0 : index
    %c55 = arith.constant 55 : index
    %c0_47 = arith.constant 0 : index
    %39 = tpu.strided_load %arg1[%c0_46, %c55, %c0_47] {strides = array<i32: 1, 2, 1>} : memref<1x324x32xf32, #tpu.memory_space<vmem>>, vector<1x8x32xf32>
    %40 = vector.shape_cast %39 : vector<1x8x32xf32> to vector<8x32xf32>
    %c8_48 = arith.constant 8 : index
    %c128_49 = arith.constant 128 : index
    %41 = vector.load %arg7[%c8_48, %c128_49] : memref<64x288xf32, #tpu.memory_space<vmem>>, vector<8x32xf32>
    tpu.vector_store %arg7[%c8_48, %c128_49], %40 {strides = array<i32>} : memref<64x288xf32, #tpu.memory_space<vmem>>, vector<8x32xf32>,
    %c0_50 = arith.constant 0 : index
    %c56 = arith.constant 56 : index
    %c0_51 = arith.constant 0 : index
    %42 = tpu.strided_load %arg1[%c0_50, %c56, %c0_51] {strides = array<i32: 1, 2, 1>} : memref<1x324x32xf32, #tpu.memory_space<vmem>>, vector<1x8x32xf32>
    %43 = vector.shape_cast %42 : vector<1x8x32xf32> to vector<8x32xf32>
    %c8_52 = arith.constant 8 : index
    %c160_53 = arith.constant 160 : index
    %44 = vector.load %arg7[%c8_52, %c160_53] : memref<64x288xf32, #tpu.memory_space<vmem>>, vector<8x32xf32>
    tpu.vector_store %arg7[%c8_52, %c160_53], %43 {strides = array<i32>} : memref<64x288xf32, #tpu.memory_space<vmem>>, vector<8x32xf32>,
    %c0_54 = arith.constant 0 : index
    %c72 = arith.constant 72 : index
    %c0_55 = arith.constant 0 : index
    %45 = tpu.strided_load %arg1[%c0_54, %c72, %c0_55] {strides = array<i32: 1, 2, 1>} : memref<1x324x32xf32, #tpu.memory_space<vmem>>, vector<1x8x32xf32>
    %46 = vector.shape_cast %45 : vector<1x8x32xf32> to vector<8x32xf32>
    %c8_56 = arith.constant 8 : index
    %c192_57 = arith.constant 192 : index
    %47 = vector.load %arg7[%c8_56, %c192_57] : memref<64x288xf32, #tpu.memory_space<vmem>>, vector<8x32xf32>
    tpu.vector_store %arg7[%c8_56, %c192_57], %46 {strides = array<i32>} : memref<64x288xf32, #tpu.memory_space<vmem>>, vector<8x32xf32>,
    %c0_58 = arith.constant 0 : index
    %c73 = arith.constant 73 : index
    %c0_59 = arith.constant 0 : index
    %48 = tpu.strided_load %arg1[%c0_58, %c73, %c0_59] {strides = array<i32: 1, 2, 1>} : memref<1x324x32xf32, #tpu.memory_space<vmem>>, vector<1x8x32xf32>
    %49 = vector.shape_cast %48 : vector<1x8x32xf32> to vector<8x32xf32>
    %c8_60 = arith.constant 8 : index
    %c224_61 = arith.constant 224 : index
    %50 = vector.load %arg7[%c8_60, %c224_61] : memref<64x288xf32, #tpu.memory_space<vmem>>, vector<8x32xf32>
    tpu.vector_store %arg7[%c8_60, %c224_61], %49 {strides = array<i32>} : memref<64x288xf32, #tpu.memory_space<vmem>>, vector<8x32xf32>,
    %c0_62 = arith.constant 0 : index
    %c74 = arith.constant 74 : index
    %c0_63 = arith.constant 0 : index
    %51 = tpu.strided_load %arg1[%c0_62, %c74, %c0_63] {strides = array<i32: 1, 2, 1>} : memref<1x324x32xf32, #tpu.memory_space<vmem>>, vector<1x8x32xf32>
    %52 = vector.shape_cast %51 : vector<1x8x32xf32> to vector<8x32xf32>
    %c8_64 = arith.constant 8 : index
    %c256_65 = arith.constant 256 : index
    %53 = vector.load %arg7[%c8_64, %c256_65] : memref<64x288xf32, #tpu.memory_space<vmem>>, vector<8x32xf32>
    tpu.vector_store %arg7[%c8_64, %c256_65], %52 {strides = array<i32>} : memref<64x288xf32, #tpu.memory_space<vmem>>, vector<8x32xf32>,
    %c0_66 = arith.constant 0 : index
    %c72_67 = arith.constant 72 : index
    %c0_68 = arith.constant 0 : index
    %54 = tpu.strided_load %arg1[%c0_66, %c72_67, %c0_68] {strides = array<i32: 1, 2, 1>} : memref<1x324x32xf32, #tpu.memory_space<vmem>>, vector<1x8x32xf32>
    %55 = vector.shape_cast %54 : vector<1x8x32xf32> to vector<8x32xf32>
    %c16 = arith.constant 16 : index
    %c0_69 = arith.constant 0 : index
    %56 = vector.load %arg7[%c16, %c0_69] : memref<64x288xf32, #tpu.memory_space<vmem>>, vector<8x32xf32>
    tpu.vector_store %arg7[%c16, %c0_69], %55 {strides = array<i32>} : memref<64x288xf32, #tpu.memory_space<vmem>>, vector<8x32xf32>,
    %c0_70 = arith.constant 0 : index
    %c73_71 = arith.constant 73 : index
    %c0_72 = arith.constant 0 : index
    %57 = tpu.strided_load %arg1[%c0_70, %c73_71, %c0_72] {strides = array<i32: 1, 2, 1>} : memref<1x324x32xf32, #tpu.memory_space<vmem>>, vector<1x8x32xf32>
    %58 = vector.shape_cast %57 : vector<1x8x32xf32> to vector<8x32xf32>
    %c16_73 = arith.constant 16 : index
    %c32_74 = arith.constant 32 : index
    %59 = vector.load %arg7[%c16_73, %c32_74] : memref<64x288xf32, #tpu.memory_space<vmem>>, vector<8x32xf32>
    tpu.vector_store %arg7[%c16_73, %c32_74], %58 {strides = array<i32>} : memref<64x288xf32, #tpu.memory_space<vmem>>, vector<8x32xf32>,
    %c0_75 = arith.constant 0 : index
    %c74_76 = arith.constant 74 : index
    %c0_77 = arith.constant 0 : index
    %60 = tpu.strided_load %arg1[%c0_75, %c74_76, %c0_77] {strides = array<i32: 1, 2, 1>} : memref<1x324x32xf32, #tpu.memory_space<vmem>>, vector<1x8x32xf32>
    %61 = vector.shape_cast %60 : vector<1x8x32xf32> to vector<8x32xf32>
    %c16_78 = arith.constant 16 : index
    %c64_79 = arith.constant 64 : index
    %62 = vector.load %arg7[%c16_78, %c64_79] : memref<64x288xf32, #tpu.memory_space<vmem>>, vector<8x32xf32>
    tpu.vector_store %arg7[%c16_78, %c64_79], %61 {strides = array<i32>} : memref<64x288xf32, #tpu.memory_space<vmem>>, vector<8x32xf32>,
    %c0_80 = arith.constant 0 : index
    %c90 = arith.constant 90 : index
    %c0_81 = arith.constant 0 : index
    %63 = tpu.strided_load %arg1[%c0_80, %c90, %c0_81] {strides = array<i32: 1, 2, 1>} : memref<1x324x32xf32, #tpu.memory_space<vmem>>, vector<1x8x32xf32>
    %64 = vector.shape_cast %63 : vector<1x8x32xf32> to vector<8x32xf32>
    %c16_82 = arith.constant 16 : index
    %c96_83 = arith.constant 96 : index
    %65 = vector.load %arg7[%c16_82, %c96_83] : memref<64x288xf32, #tpu.memory_space<vmem>>, vector<8x32xf32>
    tpu.vector_store %arg7[%c16_82, %c96_83], %64 {strides = array<i32>} : memref<64x288xf32, #tpu.memory_space<vmem>>, vector<8x32xf32>,
    %c0_84 = arith.constant 0 : index
    %c91 = arith.constant 91 : index
    %c0_85 = arith.constant 0 : index
    %66 = tpu.strided_load %arg1[%c0_84, %c91, %c0_85] {strides = array<i32: 1, 2, 1>} : memref<1x324x32xf32, #tpu.memory_space<vmem>>, vector<1x8x32xf32>
    %67 = vector.shape_cast %66 : vector<1x8x32xf32> to vector<8x32xf32>
    %c16_86 = arith.constant 16 : index
    %c128_87 = arith.constant 128 : index
    %68 = vector.load %arg7[%c16_86, %c128_87] : memref<64x288xf32, #tpu.memory_space<vmem>>, vector<8x32xf32>
    tpu.vector_store %arg7[%c16_86, %c128_87], %67 {strides = array<i32>} : memref<64x288xf32, #tpu.memory_space<vmem>>, vector<8x32xf32>,
    %c0_88 = arith.constant 0 : index
    %c92 = arith.constant 92 : index
    %c0_89 = arith.constant 0 : index
    %69 = tpu.strided_load %arg1[%c0_88, %c92, %c0_89] {strides = array<i32: 1, 2, 1>} : memref<1x324x32xf32, #tpu.memory_space<vmem>>, vector<1x8x32xf32>
    %70 = vector.shape_cast %69 : vector<1x8x32xf32> to vector<8x32xf32>
    %c16_90 = arith.constant 16 : index
    %c160_91 = arith.constant 160 : index
    %71 = vector.load %arg7[%c16_90, %c160_91] : memref<64x288xf32, #tpu.memory_space<vmem>>, vector<8x32xf32>
    tpu.vector_store %arg7[%c16_90, %c160_91], %70 {strides = array<i32>} : memref<64x288xf32, #tpu.memory_space<vmem>>, vector<8x32xf32>,
    %c0_92 = arith.constant 0 : index
    %c108 = arith.constant 108 : index
    %c0_93 = arith.constant 0 : index
    %72 = tpu.strided_load %arg1[%c0_92, %c108, %c0_93] {strides = array<i32: 1, 2, 1>} : memref<1x324x32xf32, #tpu.memory_space<vmem>>, vector<1x8x32xf32>
    %73 = vector.shape_cast %72 : vector<1x8x32xf32> to vector<8x32xf32>
    %c16_94 = arith.constant 16 : index
    %c192_95 = arith.constant 192 : index
    %74 = vector.load %arg7[%c16_94, %c192_95] : memref<64x288xf32, #tpu.memory_space<vmem>>, vector<8x32xf32>
    tpu.vector_store %arg7[%c16_94, %c192_95], %73 {strides = array<i32>} : memref<64x288xf32, #tpu.memory_space<vmem>>, vector<8x32xf32>,
    %c0_96 = arith.constant 0 : index
    %c109 = arith.constant 109 : index
    %c0_97 = arith.constant 0 : index
    %75 = tpu.strided_load %arg1[%c0_96, %c109, %c0_97] {strides = array<i32: 1, 2, 1>} : memref<1x324x32xf32, #tpu.memory_space<vmem>>, vector<1x8x32xf32>
    %76 = vector.shape_cast %75 : vector<1x8x32xf32> to vector<8x32xf32>
    %c16_98 = arith.constant 16 : index
    %c224_99 = arith.constant 224 : index
    %77 = vector.load %arg7[%c16_98, %c224_99] : memref<64x288xf32, #tpu.memory_space<vmem>>, vector<8x32xf32>
    tpu.vector_store %arg7[%c16_98, %c224_99], %76 {strides = array<i32>} : memref<64x288xf32, #tpu.memory_space<vmem>>, vector<8x32xf32>,
    %c0_100 = arith.constant 0 : index
    %c110 = arith.constant 110 : index
    %c0_101 = arith.constant 0 : index
    %78 = tpu.strided_load %arg1[%c0_100, %c110, %c0_101] {strides = array<i32: 1, 2, 1>} : memref<1x324x32xf32, #tpu.memory_space<vmem>>, vector<1x8x32xf32>
    %79 = vector.shape_cast %78 : vector<1x8x32xf32> to vector<8x32xf32>
    %c16_102 = arith.constant 16 : index
    %c256_103 = arith.constant 256 : index
    %80 = vector.load %arg7[%c16_102, %c256_103] : memref<64x288xf32, #tpu.memory_space<vmem>>, vector<8x32xf32>
    tpu.vector_store %arg7[%c16_102, %c256_103], %79 {strides = array<i32>} : memref<64x288xf32, #tpu.memory_space<vmem>>, vector<8x32xf32>,
    %c0_104 = arith.constant 0 : index
    %c108_105 = arith.constant 108 : index
    %c0_106 = arith.constant 0 : index
    %81 = tpu.strided_load %arg1[%c0_104, %c108_105, %c0_106] {strides = array<i32: 1, 2, 1>} : memref<1x324x32xf32, #tpu.memory_space<vmem>>, vector<1x8x32xf32>
    %82 = vector.shape_cast %81 : vector<1x8x32xf32> to vector<8x32xf32>
    %c24 = arith.constant 24 : index
    %c0_107 = arith.constant 0 : index
    %83 = vector.load %arg7[%c24, %c0_107] : memref<64x288xf32, #tpu.memory_space<vmem>>, vector<8x32xf32>
    tpu.vector_store %arg7[%c24, %c0_107], %82 {strides = array<i32>} : memref<64x288xf32, #tpu.memory_space<vmem>>, vector<8x32xf32>,
    %c0_108 = arith.constant 0 : index
    %c109_109 = arith.constant 109 : index
    %c0_110 = arith.constant 0 : index
    %84 = tpu.strided_load %arg1[%c0_108, %c109_109, %c0_110] {strides = array<i32: 1, 2, 1>} : memref<1x324x32xf32, #tpu.memory_space<vmem>>, vector<1x8x32xf32>
    %85 = vector.shape_cast %84 : vector<1x8x32xf32> to vector<8x32xf32>
    %c24_111 = arith.constant 24 : index
    %c32_112 = arith.constant 32 : index
    %86 = vector.load %arg7[%c24_111, %c32_112] : memref<64x288xf32, #tpu.memory_space<vmem>>, vector<8x32xf32>
    tpu.vector_store %arg7[%c24_111, %c32_112], %85 {strides = array<i32>} : memref<64x288xf32, #tpu.memory_space<vmem>>, vector<8x32xf32>,
    %c0_113 = arith.constant 0 : index
    %c110_114 = arith.constant 110 : index
    %c0_115 = arith.constant 0 : index
    %87 = tpu.strided_load %arg1[%c0_113, %c110_114, %c0_115] {strides = array<i32: 1, 2, 1>} : memref<1x324x32xf32, #tpu.memory_space<vmem>>, vector<1x8x32xf32>
    %88 = vector.shape_cast %87 : vector<1x8x32xf32> to vector<8x32xf32>
    %c24_116 = arith.constant 24 : index
    %c64_117 = arith.constant 64 : index
    %89 = vector.load %arg7[%c24_116, %c64_117] : memref<64x288xf32, #tpu.memory_space<vmem>>, vector<8x32xf32>
    tpu.vector_store %arg7[%c24_116, %c64_117], %88 {strides = array<i32>} : memref<64x288xf32, #tpu.memory_space<vmem>>, vector<8x32xf32>,
    %c0_118 = arith.constant 0 : index
    %c126 = arith.constant 126 : index
    %c0_119 = arith.constant 0 : index
    %90 = tpu.strided_load %arg1[%c0_118, %c126, %c0_119] {strides = array<i32: 1, 2, 1>} : memref<1x324x32xf32, #tpu.memory_space<vmem>>, vector<1x8x32xf32>
    %91 = vector.shape_cast %90 : vector<1x8x32xf32> to vector<8x32xf32>
    %c24_120 = arith.constant 24 : index
    %c96_121 = arith.constant 96 : index
    %92 = vector.load %arg7[%c24_120, %c96_121] : memref<64x288xf32, #tpu.memory_space<vmem>>, vector<8x32xf32>
    tpu.vector_store %arg7[%c24_120, %c96_121], %91 {strides = array<i32>} : memref<64x288xf32, #tpu.memory_space<vmem>>, vector<8x32xf32>,
    %c0_122 = arith.constant 0 : index
    %c127 = arith.constant 127 : index
    %c0_123 = arith.constant 0 : index
    %93 = tpu.strided_load %arg1[%c0_122, %c127, %c0_123] {strides = array<i32: 1, 2, 1>} : memref<1x324x32xf32, #tpu.memory_space<vmem>>, vector<1x8x32xf32>
    %94 = vector.shape_cast %93 : vector<1x8x32xf32> to vector<8x32xf32>
    %c24_124 = arith.constant 24 : index
    %c128_125 = arith.constant 128 : index
    %95 = vector.load %arg7[%c24_124, %c128_125] : memref<64x288xf32, #tpu.memory_space<vmem>>, vector<8x32xf32>
    tpu.vector_store %arg7[%c24_124, %c128_125], %94 {strides = array<i32>} : memref<64x288xf32, #tpu.memory_space<vmem>>, vector<8x32xf32>,
    %c0_126 = arith.constant 0 : index
    %c128_127 = arith.constant 128 : index
    %c0_128 = arith.constant 0 : index
    %96 = tpu.strided_load %arg1[%c0_126, %c128_127, %c0_128] {strides = array<i32: 1, 2, 1>} : memref<1x324x32xf32, #tpu.memory_space<vmem>>, vector<1x8x32xf32>
    %97 = vector.shape_cast %96 : vector<1x8x32xf32> to vector<8x32xf32>
    %c24_129 = arith.constant 24 : index
    %c160_130 = arith.constant 160 : index
    %98 = vector.load %arg7[%c24_129, %c160_130] : memref<64x288xf32, #tpu.memory_space<vmem>>, vector<8x32xf32>
    tpu.vector_store %arg7[%c24_129, %c160_130], %97 {strides = array<i32>} : memref<64x288xf32, #tpu.memory_space<vmem>>, vector<8x32xf32>,
    %c0_131 = arith.constant 0 : index
    %c144 = arith.constant 144 : index
    %c0_132 = arith.constant 0 : index
    %99 = tpu.strided_load %arg1[%c0_131, %c144, %c0_132] {strides = array<i32: 1, 2, 1>} : memref<1x324x32xf32, #tpu.memory_space<vmem>>, vector<1x8x32xf32>
    %100 = vector.shape_cast %99 : vector<1x8x32xf32> to vector<8x32xf32>
    %c24_133 = arith.constant 24 : index
    %c192_134 = arith.constant 192 : index
    %101 = vector.load %arg7[%c24_133, %c192_134] : memref<64x288xf32, #tpu.memory_space<vmem>>, vector<8x32xf32>
    tpu.vector_store %arg7[%c24_133, %c192_134], %100 {strides = array<i32>} : memref<64x288xf32, #tpu.memory_space<vmem>>, vector<8x32xf32>,
    %c0_135 = arith.constant 0 : index
    %c145 = arith.constant 145 : index
    %c0_136 = arith.constant 0 : index
    %102 = tpu.strided_load %arg1[%c0_135, %c145, %c0_136] {strides = array<i32: 1, 2, 1>} : memref<1x324x32xf32, #tpu.memory_space<vmem>>, vector<1x8x32xf32>
    %103 = vector.shape_cast %102 : vector<1x8x32xf32> to vector<8x32xf32>
    %c24_137 = arith.constant 24 : index
    %c224_138 = arith.constant 224 : index
    %104 = vector.load %arg7[%c24_137, %c224_138] : memref<64x288xf32, #tpu.memory_space<vmem>>, vector<8x32xf32>
    tpu.vector_store %arg7[%c24_137, %c224_138], %103 {strides = array<i32>} : memref<64x288xf32, #tpu.memory_space<vmem>>, vector<8x32xf32>,
    %c0_139 = arith.constant 0 : index
    %c146 = arith.constant 146 : index
    %c0_140 = arith.constant 0 : index
    %105 = tpu.strided_load %arg1[%c0_139, %c146, %c0_140] {strides = array<i32: 1, 2, 1>} : memref<1x324x32xf32, #tpu.memory_space<vmem>>, vector<1x8x32xf32>
    %106 = vector.shape_cast %105 : vector<1x8x32xf32> to vector<8x32xf32>
    %c24_141 = arith.constant 24 : index
    %c256_142 = arith.constant 256 : index
    %107 = vector.load %arg7[%c24_141, %c256_142] : memref<64x288xf32, #tpu.memory_space<vmem>>, vector<8x32xf32>
    tpu.vector_store %arg7[%c24_141, %c256_142], %106 {strides = array<i32>} : memref<64x288xf32, #tpu.memory_space<vmem>>, vector<8x32xf32>,
    %c0_143 = arith.constant 0 : index
    %c144_144 = arith.constant 144 : index
    %c0_145 = arith.constant 0 : index
    %108 = tpu.strided_load %arg1[%c0_143, %c144_144, %c0_145] {strides = array<i32: 1, 2, 1>} : memref<1x324x32xf32, #tpu.memory_space<vmem>>, vector<1x8x32xf32>
    %109 = vector.shape_cast %108 : vector<1x8x32xf32> to vector<8x32xf32>
    %c32_146 = arith.constant 32 : index
    %c0_147 = arith.constant 0 : index
    %110 = vector.load %arg7[%c32_146, %c0_147] : memref<64x288xf32, #tpu.memory_space<vmem>>, vector<8x32xf32>
    tpu.vector_store %arg7[%c32_146, %c0_147], %109 {strides = array<i32>} : memref<64x288xf32, #tpu.memory_space<vmem>>, vector<8x32xf32>,
    %c0_148 = arith.constant 0 : index
    %c145_149 = arith.constant 145 : index
    %c0_150 = arith.constant 0 : index
    %111 = tpu.strided_load %arg1[%c0_148, %c145_149, %c0_150] {strides = array<i32: 1, 2, 1>} : memref<1x324x32xf32, #tpu.memory_space<vmem>>, vector<1x8x32xf32>
    %112 = vector.shape_cast %111 : vector<1x8x32xf32> to vector<8x32xf32>
    %c32_151 = arith.constant 32 : index
    %c32_152 = arith.constant 32 : index
    %113 = vector.load %arg7[%c32_151, %c32_152] : memref<64x288xf32, #tpu.memory_space<vmem>>, vector<8x32xf32>
    tpu.vector_store %arg7[%c32_151, %c32_152], %112 {strides = array<i32>} : memref<64x288xf32, #tpu.memory_space<vmem>>, vector<8x32xf32>,
    %c0_153 = arith.constant 0 : index
    %c146_154 = arith.constant 146 : index
    %c0_155 = arith.constant 0 : index
    %114 = tpu.strided_load %arg1[%c0_153, %c146_154, %c0_155] {strides = array<i32: 1, 2, 1>} : memref<1x324x32xf32, #tpu.memory_space<vmem>>, vector<1x8x32xf32>
    %115 = vector.shape_cast %114 : vector<1x8x32xf32> to vector<8x32xf32>
    %c32_156 = arith.constant 32 : index
    %c64_157 = arith.constant 64 : index
    %116 = vector.load %arg7[%c32_156, %c64_157] : memref<64x288xf32, #tpu.memory_space<vmem>>, vector<8x32xf32>
    tpu.vector_store %arg7[%c32_156, %c64_157], %115 {strides = array<i32>} : memref<64x288xf32, #tpu.memory_space<vmem>>, vector<8x32xf32>,
    %c0_158 = arith.constant 0 : index
    %c162 = arith.constant 162 : index
    %c0_159 = arith.constant 0 : index
    %117 = tpu.strided_load %arg1[%c0_158, %c162, %c0_159] {strides = array<i32: 1, 2, 1>} : memref<1x324x32xf32, #tpu.memory_space<vmem>>, vector<1x8x32xf32>
    %118 = vector.shape_cast %117 : vector<1x8x32xf32> to vector<8x32xf32>
    %c32_160 = arith.constant 32 : index
    %c96_161 = arith.constant 96 : index
    %119 = vector.load %arg7[%c32_160, %c96_161] : memref<64x288xf32, #tpu.memory_space<vmem>>, vector<8x32xf32>
    tpu.vector_store %arg7[%c32_160, %c96_161], %118 {strides = array<i32>} : memref<64x288xf32, #tpu.memory_space<vmem>>, vector<8x32xf32>,
    %c0_162 = arith.constant 0 : index
    %c163 = arith.constant 163 : index
    %c0_163 = arith.constant 0 : index
    %120 = tpu.strided_load %arg1[%c0_162, %c163, %c0_163] {strides = array<i32: 1, 2, 1>} : memref<1x324x32xf32, #tpu.memory_space<vmem>>, vector<1x8x32xf32>
    %121 = vector.shape_cast %120 : vector<1x8x32xf32> to vector<8x32xf32>
    %c32_164 = arith.constant 32 : index
    %c128_165 = arith.constant 128 : index
    %122 = vector.load %arg7[%c32_164, %c128_165] : memref<64x288xf32, #tpu.memory_space<vmem>>, vector<8x32xf32>
    tpu.vector_store %arg7[%c32_164, %c128_165], %121 {strides = array<i32>} : memref<64x288xf32, #tpu.memory_space<vmem>>, vector<8x32xf32>,
    %c0_166 = arith.constant 0 : index
    %c164 = arith.constant 164 : index
    %c0_167 = arith.constant 0 : index
    %123 = tpu.strided_load %arg1[%c0_166, %c164, %c0_167] {strides = array<i32: 1, 2, 1>} : memref<1x324x32xf32, #tpu.memory_space<vmem>>, vector<1x8x32xf32>
    %124 = vector.shape_cast %123 : vector<1x8x32xf32> to vector<8x32xf32>
    %c32_168 = arith.constant 32 : index
    %c160_169 = arith.constant 160 : index
    %125 = vector.load %arg7[%c32_168, %c160_169] : memref<64x288xf32, #tpu.memory_space<vmem>>, vector<8x32xf32>
    tpu.vector_store %arg7[%c32_168, %c160_169], %124 {strides = array<i32>} : memref<64x288xf32, #tpu.memory_space<vmem>>, vector<8x32xf32>,
    %c0_170 = arith.constant 0 : index
    %c180 = arith.constant 180 : index
    %c0_171 = arith.constant 0 : index
    %126 = tpu.strided_load %arg1[%c0_170, %c180, %c0_171] {strides = array<i32: 1, 2, 1>} : memref<1x324x32xf32, #tpu.memory_space<vmem>>, vector<1x8x32xf32>
    %127 = vector.shape_cast %126 : vector<1x8x32xf32> to vector<8x32xf32>
    %c32_172 = arith.constant 32 : index
    %c192_173 = arith.constant 192 : index
    %128 = vector.load %arg7[%c32_172, %c192_173] : memref<64x288xf32, #tpu.memory_space<vmem>>, vector<8x32xf32>
    tpu.vector_store %arg7[%c32_172, %c192_173], %127 {strides = array<i32>} : memref<64x288xf32, #tpu.memory_space<vmem>>, vector<8x32xf32>,
    %c0_174 = arith.constant 0 : index
    %c181 = arith.constant 181 : index
    %c0_175 = arith.constant 0 : index
    %129 = tpu.strided_load %arg1[%c0_174, %c181, %c0_175] {strides = array<i32: 1, 2, 1>} : memref<1x324x32xf32, #tpu.memory_space<vmem>>, vector<1x8x32xf32>
    %130 = vector.shape_cast %129 : vector<1x8x32xf32> to vector<8x32xf32>
    %c32_176 = arith.constant 32 : index
    %c224_177 = arith.constant 224 : index
    %131 = vector.load %arg7[%c32_176, %c224_177] : memref<64x288xf32, #tpu.memory_space<vmem>>, vector<8x32xf32>
    tpu.vector_store %arg7[%c32_176, %c224_177], %130 {strides = array<i32>} : memref<64x288xf32, #tpu.memory_space<vmem>>, vector<8x32xf32>,
    %c0_178 = arith.constant 0 : index
    %c182 = arith.constant 182 : index
    %c0_179 = arith.constant 0 : index
    %132 = tpu.strided_load %arg1[%c0_178, %c182, %c0_179] {strides = array<i32: 1, 2, 1>} : memref<1x324x32xf32, #tpu.memory_space<vmem>>, vector<1x8x32xf32>
    %133 = vector.shape_cast %132 : vector<1x8x32xf32> to vector<8x32xf32>
    %c32_180 = arith.constant 32 : index
    %c256_181 = arith.constant 256 : index
    %134 = vector.load %arg7[%c32_180, %c256_181] : memref<64x288xf32, #tpu.memory_space<vmem>>, vector<8x32xf32>
    tpu.vector_store %arg7[%c32_180, %c256_181], %133 {strides = array<i32>} : memref<64x288xf32, #tpu.memory_space<vmem>>, vector<8x32xf32>,
    %c0_182 = arith.constant 0 : index
    %c180_183 = arith.constant 180 : index
    %c0_184 = arith.constant 0 : index
    %135 = tpu.strided_load %arg1[%c0_182, %c180_183, %c0_184] {strides = array<i32: 1, 2, 1>} : memref<1x324x32xf32, #tpu.memory_space<vmem>>, vector<1x8x32xf32>
    %136 = vector.shape_cast %135 : vector<1x8x32xf32> to vector<8x32xf32>
    %c40 = arith.constant 40 : index
    %c0_185 = arith.constant 0 : index
    %137 = vector.load %arg7[%c40, %c0_185] : memref<64x288xf32, #tpu.memory_space<vmem>>, vector<8x32xf32>
    tpu.vector_store %arg7[%c40, %c0_185], %136 {strides = array<i32>} : memref<64x288xf32, #tpu.memory_space<vmem>>, vector<8x32xf32>,
    %c0_186 = arith.constant 0 : index
    %c181_187 = arith.constant 181 : index
    %c0_188 = arith.constant 0 : index
    %138 = tpu.strided_load %arg1[%c0_186, %c181_187, %c0_188] {strides = array<i32: 1, 2, 1>} : memref<1x324x32xf32, #tpu.memory_space<vmem>>, vector<1x8x32xf32>
    %139 = vector.shape_cast %138 : vector<1x8x32xf32> to vector<8x32xf32>
    %c40_189 = arith.constant 40 : index
    %c32_190 = arith.constant 32 : index
    %140 = vector.load %arg7[%c40_189, %c32_190] : memref<64x288xf32, #tpu.memory_space<vmem>>, vector<8x32xf32>
    tpu.vector_store %arg7[%c40_189, %c32_190], %139 {strides = array<i32>} : memref<64x288xf32, #tpu.memory_space<vmem>>, vector<8x32xf32>,
    %c0_191 = arith.constant 0 : index
    %c182_192 = arith.constant 182 : index
    %c0_193 = arith.constant 0 : index
    %141 = tpu.strided_load %arg1[%c0_191, %c182_192, %c0_193] {strides = array<i32: 1, 2, 1>} : memref<1x324x32xf32, #tpu.memory_space<vmem>>, vector<1x8x32xf32>
    %142 = vector.shape_cast %141 : vector<1x8x32xf32> to vector<8x32xf32>
    %c40_194 = arith.constant 40 : index
    %c64_195 = arith.constant 64 : index
    %143 = vector.load %arg7[%c40_194, %c64_195] : memref<64x288xf32, #tpu.memory_space<vmem>>, vector<8x32xf32>
    tpu.vector_store %arg7[%c40_194, %c64_195], %142 {strides = array<i32>} : memref<64x288xf32, #tpu.memory_space<vmem>>, vector<8x32xf32>,
    %c0_196 = arith.constant 0 : index
    %c198 = arith.constant 198 : index
    %c0_197 = arith.constant 0 : index
    %144 = tpu.strided_load %arg1[%c0_196, %c198, %c0_197] {strides = array<i32: 1, 2, 1>} : memref<1x324x32xf32, #tpu.memory_space<vmem>>, vector<1x8x32xf32>
    %145 = vector.shape_cast %144 : vector<1x8x32xf32> to vector<8x32xf32>
    %c40_198 = arith.constant 40 : index
    %c96_199 = arith.constant 96 : index
    %146 = vector.load %arg7[%c40_198, %c96_199] : memref<64x288xf32, #tpu.memory_space<vmem>>, vector<8x32xf32>
    tpu.vector_store %arg7[%c40_198, %c96_199], %145 {strides = array<i32>} : memref<64x288xf32, #tpu.memory_space<vmem>>, vector<8x32xf32>,
    %c0_200 = arith.constant 0 : index
    %c199 = arith.constant 199 : index
    %c0_201 = arith.constant 0 : index
    %147 = tpu.strided_load %arg1[%c0_200, %c199, %c0_201] {strides = array<i32: 1, 2, 1>} : memref<1x324x32xf32, #tpu.memory_space<vmem>>, vector<1x8x32xf32>
    %148 = vector.shape_cast %147 : vector<1x8x32xf32> to vector<8x32xf32>
    %c40_202 = arith.constant 40 : index
    %c128_203 = arith.constant 128 : index
    %149 = vector.load %arg7[%c40_202, %c128_203] : memref<64x288xf32, #tpu.memory_space<vmem>>, vector<8x32xf32>
    tpu.vector_store %arg7[%c40_202, %c128_203], %148 {strides = array<i32>} : memref<64x288xf32, #tpu.memory_space<vmem>>, vector<8x32xf32>,
    %c0_204 = arith.constant 0 : index
    %c200 = arith.constant 200 : index
    %c0_205 = arith.constant 0 : index
    %150 = tpu.strided_load %arg1[%c0_204, %c200, %c0_205] {strides = array<i32: 1, 2, 1>} : memref<1x324x32xf32, #tpu.memory_space<vmem>>, vector<1x8x32xf32>
    %151 = vector.shape_cast %150 : vector<1x8x32xf32> to vector<8x32xf32>
    %c40_206 = arith.constant 40 : index
    %c160_207 = arith.constant 160 : index
    %152 = vector.load %arg7[%c40_206, %c160_207] : memref<64x288xf32, #tpu.memory_space<vmem>>, vector<8x32xf32>
    tpu.vector_store %arg7[%c40_206, %c160_207], %151 {strides = array<i32>} : memref<64x288xf32, #tpu.memory_space<vmem>>, vector<8x32xf32>,
    %c0_208 = arith.constant 0 : index
    %c216 = arith.constant 216 : index
    %c0_209 = arith.constant 0 : index
    %153 = tpu.strided_load %arg1[%c0_208, %c216, %c0_209] {strides = array<i32: 1, 2, 1>} : memref<1x324x32xf32, #tpu.memory_space<vmem>>, vector<1x8x32xf32>
    %154 = vector.shape_cast %153 : vector<1x8x32xf32> to vector<8x32xf32>
    %c40_210 = arith.constant 40 : index
    %c192_211 = arith.constant 192 : index
    %155 = vector.load %arg7[%c40_210, %c192_211] : memref<64x288xf32, #tpu.memory_space<vmem>>, vector<8x32xf32>
    tpu.vector_store %arg7[%c40_210, %c192_211], %154 {strides = array<i32>} : memref<64x288xf32, #tpu.memory_space<vmem>>, vector<8x32xf32>,
    %c0_212 = arith.constant 0 : index
    %c217 = arith.constant 217 : index
    %c0_213 = arith.constant 0 : index
    %156 = tpu.strided_load %arg1[%c0_212, %c217, %c0_213] {strides = array<i32: 1, 2, 1>} : memref<1x324x32xf32, #tpu.memory_space<vmem>>, vector<1x8x32xf32>
    %157 = vector.shape_cast %156 : vector<1x8x32xf32> to vector<8x32xf32>
    %c40_214 = arith.constant 40 : index
    %c224_215 = arith.constant 224 : index
    %158 = vector.load %arg7[%c40_214, %c224_215] : memref<64x288xf32, #tpu.memory_space<vmem>>, vector<8x32xf32>
    tpu.vector_store %arg7[%c40_214, %c224_215], %157 {strides = array<i32>} : memref<64x288xf32, #tpu.memory_space<vmem>>, vector<8x32xf32>,
    %c0_216 = arith.constant 0 : index
    %c218 = arith.constant 218 : index
    %c0_217 = arith.constant 0 : index
    %159 = tpu.strided_load %arg1[%c0_216, %c218, %c0_217] {strides = array<i32: 1, 2, 1>} : memref<1x324x32xf32, #tpu.memory_space<vmem>>, vector<1x8x32xf32>
    %160 = vector.shape_cast %159 : vector<1x8x32xf32> to vector<8x32xf32>
    %c40_218 = arith.constant 40 : index
    %c256_219 = arith.constant 256 : index
    %161 = vector.load %arg7[%c40_218, %c256_219] : memref<64x288xf32, #tpu.memory_space<vmem>>, vector<8x32xf32>
    tpu.vector_store %arg7[%c40_218, %c256_219], %160 {strides = array<i32>} : memref<64x288xf32, #tpu.memory_space<vmem>>, vector<8x32xf32>,
    %c0_220 = arith.constant 0 : index
    %c216_221 = arith.constant 216 : index
    %c0_222 = arith.constant 0 : index
    %162 = tpu.strided_load %arg1[%c0_220, %c216_221, %c0_222] {strides = array<i32: 1, 2, 1>} : memref<1x324x32xf32, #tpu.memory_space<vmem>>, vector<1x8x32xf32>
    %163 = vector.shape_cast %162 : vector<1x8x32xf32> to vector<8x32xf32>
    %c48 = arith.constant 48 : index
    %c0_223 = arith.constant 0 : index
    %164 = vector.load %arg7[%c48, %c0_223] : memref<64x288xf32, #tpu.memory_space<vmem>>, vector<8x32xf32>
    tpu.vector_store %arg7[%c48, %c0_223], %163 {strides = array<i32>} : memref<64x288xf32, #tpu.memory_space<vmem>>, vector<8x32xf32>,
    %c0_224 = arith.constant 0 : index
    %c217_225 = arith.constant 217 : index
    %c0_226 = arith.constant 0 : index
    %165 = tpu.strided_load %arg1[%c0_224, %c217_225, %c0_226] {strides = array<i32: 1, 2, 1>} : memref<1x324x32xf32, #tpu.memory_space<vmem>>, vector<1x8x32xf32>
    %166 = vector.shape_cast %165 : vector<1x8x32xf32> to vector<8x32xf32>
    %c48_227 = arith.constant 48 : index
    %c32_228 = arith.constant 32 : index
    %167 = vector.load %arg7[%c48_227, %c32_228] : memref<64x288xf32, #tpu.memory_space<vmem>>, vector<8x32xf32>
    tpu.vector_store %arg7[%c48_227, %c32_228], %166 {strides = array<i32>} : memref<64x288xf32, #tpu.memory_space<vmem>>, vector<8x32xf32>,
    %c0_229 = arith.constant 0 : index
    %c218_230 = arith.constant 218 : index
    %c0_231 = arith.constant 0 : index
    %168 = tpu.strided_load %arg1[%c0_229, %c218_230, %c0_231] {strides = array<i32: 1, 2, 1>} : memref<1x324x32xf32, #tpu.memory_space<vmem>>, vector<1x8x32xf32>
    %169 = vector.shape_cast %168 : vector<1x8x32xf32> to vector<8x32xf32>
    %c48_232 = arith.constant 48 : index
    %c64_233 = arith.constant 64 : index
    %170 = vector.load %arg7[%c48_232, %c64_233] : memref<64x288xf32, #tpu.memory_space<vmem>>, vector<8x32xf32>
    tpu.vector_store %arg7[%c48_232, %c64_233], %169 {strides = array<i32>} : memref<64x288xf32, #tpu.memory_space<vmem>>, vector<8x32xf32>,
    %c0_234 = arith.constant 0 : index
    %c234 = arith.constant 234 : index
    %c0_235 = arith.constant 0 : index
    %171 = tpu.strided_load %arg1[%c0_234, %c234, %c0_235] {strides = array<i32: 1, 2, 1>} : memref<1x324x32xf32, #tpu.memory_space<vmem>>, vector<1x8x32xf32>
    %172 = vector.shape_cast %171 : vector<1x8x32xf32> to vector<8x32xf32>
    %c48_236 = arith.constant 48 : index
    %c96_237 = arith.constant 96 : index
    %173 = vector.load %arg7[%c48_236, %c96_237] : memref<64x288xf32, #tpu.memory_space<vmem>>, vector<8x32xf32>
    tpu.vector_store %arg7[%c48_236, %c96_237], %172 {strides = array<i32>} : memref<64x288xf32, #tpu.memory_space<vmem>>, vector<8x32xf32>,
    %c0_238 = arith.constant 0 : index
    %c235 = arith.constant 235 : index
    %c0_239 = arith.constant 0 : index
    %174 = tpu.strided_load %arg1[%c0_238, %c235, %c0_239] {strides = array<i32: 1, 2, 1>} : memref<1x324x32xf32, #tpu.memory_space<vmem>>, vector<1x8x32xf32>
    %175 = vector.shape_cast %174 : vector<1x8x32xf32> to vector<8x32xf32>
    %c48_240 = arith.constant 48 : index
    %c128_241 = arith.constant 128 : index
    %176 = vector.load %arg7[%c48_240, %c128_241] : memref<64x288xf32, #tpu.memory_space<vmem>>, vector<8x32xf32>
    tpu.vector_store %arg7[%c48_240, %c128_241], %175 {strides = array<i32>} : memref<64x288xf32, #tpu.memory_space<vmem>>, vector<8x32xf32>,
    %c0_242 = arith.constant 0 : index
    %c236 = arith.constant 236 : index
    %c0_243 = arith.constant 0 : index
    %177 = tpu.strided_load %arg1[%c0_242, %c236, %c0_243] {strides = array<i32: 1, 2, 1>} : memref<1x324x32xf32, #tpu.memory_space<vmem>>, vector<1x8x32xf32>
    %178 = vector.shape_cast %177 : vector<1x8x32xf32> to vector<8x32xf32>
    %c48_244 = arith.constant 48 : index
    %c160_245 = arith.constant 160 : index
    %179 = vector.load %arg7[%c48_244, %c160_245] : memref<64x288xf32, #tpu.memory_space<vmem>>, vector<8x32xf32>
    tpu.vector_store %arg7[%c48_244, %c160_245], %178 {strides = array<i32>} : memref<64x288xf32, #tpu.memory_space<vmem>>, vector<8x32xf32>,
    %c0_246 = arith.constant 0 : index
    %c252 = arith.constant 252 : index
    %c0_247 = arith.constant 0 : index
    %180 = tpu.strided_load %arg1[%c0_246, %c252, %c0_247] {strides = array<i32: 1, 2, 1>} : memref<1x324x32xf32, #tpu.memory_space<vmem>>, vector<1x8x32xf32>
    %181 = vector.shape_cast %180 : vector<1x8x32xf32> to vector<8x32xf32>
    %c48_248 = arith.constant 48 : index
    %c192_249 = arith.constant 192 : index
    %182 = vector.load %arg7[%c48_248, %c192_249] : memref<64x288xf32, #tpu.memory_space<vmem>>, vector<8x32xf32>
    tpu.vector_store %arg7[%c48_248, %c192_249], %181 {strides = array<i32>} : memref<64x288xf32, #tpu.memory_space<vmem>>, vector<8x32xf32>,
    %c0_250 = arith.constant 0 : index
    %c253 = arith.constant 253 : index
    %c0_251 = arith.constant 0 : index
    %183 = tpu.strided_load %arg1[%c0_250, %c253, %c0_251] {strides = array<i32: 1, 2, 1>} : memref<1x324x32xf32, #tpu.memory_space<vmem>>, vector<1x8x32xf32>
    %184 = vector.shape_cast %183 : vector<1x8x32xf32> to vector<8x32xf32>
    %c48_252 = arith.constant 48 : index
    %c224_253 = arith.constant 224 : index
    %185 = vector.load %arg7[%c48_252, %c224_253] : memref<64x288xf32, #tpu.memory_space<vmem>>, vector<8x32xf32>
    tpu.vector_store %arg7[%c48_252, %c224_253], %184 {strides = array<i32>} : memref<64x288xf32, #tpu.memory_space<vmem>>, vector<8x32xf32>,
    %c0_254 = arith.constant 0 : index
    %c254 = arith.constant 254 : index
    %c0_255 = arith.constant 0 : index
    %186 = tpu.strided_load %arg1[%c0_254, %c254, %c0_255] {strides = array<i32: 1, 2, 1>} : memref<1x324x32xf32, #tpu.memory_space<vmem>>, vector<1x8x32xf32>
    %187 = vector.shape_cast %186 : vector<1x8x32xf32> to vector<8x32xf32>
    %c48_256 = arith.constant 48 : index
    %c256_257 = arith.constant 256 : index
    %188 = vector.load %arg7[%c48_256, %c256_257] : memref<64x288xf32, #tpu.memory_space<vmem>>, vector<8x32xf32>
    tpu.vector_store %arg7[%c48_256, %c256_257], %187 {strides = array<i32>} : memref<64x288xf32, #tpu.memory_space<vmem>>, vector<8x32xf32>,
    %c0_258 = arith.constant 0 : index
    %c252_259 = arith.constant 252 : index
    %c0_260 = arith.constant 0 : index
    %189 = tpu.strided_load %arg1[%c0_258, %c252_259, %c0_260] {strides = array<i32: 1, 2, 1>} : memref<1x324x32xf32, #tpu.memory_space<vmem>>, vector<1x8x32xf32>
    %190 = vector.shape_cast %189 : vector<1x8x32xf32> to vector<8x32xf32>
    %c56_261 = arith.constant 56 : index
    %c0_262 = arith.constant 0 : index
    %191 = vector.load %arg7[%c56_261, %c0_262] : memref<64x288xf32, #tpu.memory_space<vmem>>, vector<8x32xf32>
    tpu.vector_store %arg7[%c56_261, %c0_262], %190 {strides = array<i32>} : memref<64x288xf32, #tpu.memory_space<vmem>>, vector<8x32xf32>,
    %c0_263 = arith.constant 0 : index
    %c253_264 = arith.constant 253 : index
    %c0_265 = arith.constant 0 : index
    %192 = tpu.strided_load %arg1[%c0_263, %c253_264, %c0_265] {strides = array<i32: 1, 2, 1>} : memref<1x324x32xf32, #tpu.memory_space<vmem>>, vector<1x8x32xf32>
    %193 = vector.shape_cast %192 : vector<1x8x32xf32> to vector<8x32xf32>
    %c56_266 = arith.constant 56 : index
    %c32_267 = arith.constant 32 : index
    %194 = vector.load %arg7[%c56_266, %c32_267] : memref<64x288xf32, #tpu.memory_space<vmem>>, vector<8x32xf32>
    tpu.vector_store %arg7[%c56_266, %c32_267], %193 {strides = array<i32>} : memref<64x288xf32, #tpu.memory_space<vmem>>, vector<8x32xf32>,
    %c0_268 = arith.constant 0 : index
    %c254_269 = arith.constant 254 : index
    %c0_270 = arith.constant 0 : index
    %195 = tpu.strided_load %arg1[%c0_268, %c254_269, %c0_270] {strides = array<i32: 1, 2, 1>} : memref<1x324x32xf32, #tpu.memory_space<vmem>>, vector<1x8x32xf32>
    %196 = vector.shape_cast %195 : vector<1x8x32xf32> to vector<8x32xf32>
    %c56_271 = arith.constant 56 : index
    %c64_272 = arith.constant 64 : index
    %197 = vector.load %arg7[%c56_271, %c64_272] : memref<64x288xf32, #tpu.memory_space<vmem>>, vector<8x32xf32>
    tpu.vector_store %arg7[%c56_271, %c64_272], %196 {strides = array<i32>} : memref<64x288xf32, #tpu.memory_space<vmem>>, vector<8x32xf32>,
    %c0_273 = arith.constant 0 : index
    %c270 = arith.constant 270 : index
    %c0_274 = arith.constant 0 : index
    %198 = tpu.strided_load %arg1[%c0_273, %c270, %c0_274] {strides = array<i32: 1, 2, 1>} : memref<1x324x32xf32, #tpu.memory_space<vmem>>, vector<1x8x32xf32>
    %199 = vector.shape_cast %198 : vector<1x8x32xf32> to vector<8x32xf32>
    %c56_275 = arith.constant 56 : index
    %c96_276 = arith.constant 96 : index
    %200 = vector.load %arg7[%c56_275, %c96_276] : memref<64x288xf32, #tpu.memory_space<vmem>>, vector<8x32xf32>
    tpu.vector_store %arg7[%c56_275, %c96_276], %199 {strides = array<i32>} : memref<64x288xf32, #tpu.memory_space<vmem>>, vector<8x32xf32>,
    %c0_277 = arith.constant 0 : index
    %c271 = arith.constant 271 : index
    %c0_278 = arith.constant 0 : index
    %201 = tpu.strided_load %arg1[%c0_277, %c271, %c0_278] {strides = array<i32: 1, 2, 1>} : memref<1x324x32xf32, #tpu.memory_space<vmem>>, vector<1x8x32xf32>
    %202 = vector.shape_cast %201 : vector<1x8x32xf32> to vector<8x32xf32>
    %c56_279 = arith.constant 56 : index
    %c128_280 = arith.constant 128 : index
    %203 = vector.load %arg7[%c56_279, %c128_280] : memref<64x288xf32, #tpu.memory_space<vmem>>, vector<8x32xf32>
    tpu.vector_store %arg7[%c56_279, %c128_280], %202 {strides = array<i32>} : memref<64x288xf32, #tpu.memory_space<vmem>>, vector<8x32xf32>,
    %c0_281 = arith.constant 0 : index
    %c272 = arith.constant 272 : index
    %c0_282 = arith.constant 0 : index
    %204 = tpu.strided_load %arg1[%c0_281, %c272, %c0_282] {strides = array<i32: 1, 2, 1>} : memref<1x324x32xf32, #tpu.memory_space<vmem>>, vector<1x8x32xf32>
    %205 = vector.shape_cast %204 : vector<1x8x32xf32> to vector<8x32xf32>
    %c56_283 = arith.constant 56 : index
    %c160_284 = arith.constant 160 : index
    %206 = vector.load %arg7[%c56_283, %c160_284] : memref<64x288xf32, #tpu.memory_space<vmem>>, vector<8x32xf32>
    tpu.vector_store %arg7[%c56_283, %c160_284], %205 {strides = array<i32>} : memref<64x288xf32, #tpu.memory_space<vmem>>, vector<8x32xf32>,
    %c0_285 = arith.constant 0 : index
    %c288 = arith.constant 288 : index
    %c0_286 = arith.constant 0 : index
    %207 = tpu.strided_load %arg1[%c0_285, %c288, %c0_286] {strides = array<i32: 1, 2, 1>} : memref<1x324x32xf32, #tpu.memory_space<vmem>>, vector<1x8x32xf32>
    %208 = vector.shape_cast %207 : vector<1x8x32xf32> to vector<8x32xf32>
    %c56_287 = arith.constant 56 : index
    %c192_288 = arith.constant 192 : index
    %209 = vector.load %arg7[%c56_287, %c192_288] : memref<64x288xf32, #tpu.memory_space<vmem>>, vector<8x32xf32>
    tpu.vector_store %arg7[%c56_287, %c192_288], %208 {strides = array<i32>} : memref<64x288xf32, #tpu.memory_space<vmem>>, vector<8x32xf32>,
    %c0_289 = arith.constant 0 : index
    %c289 = arith.constant 289 : index
    %c0_290 = arith.constant 0 : index
    %210 = tpu.strided_load %arg1[%c0_289, %c289, %c0_290] {strides = array<i32: 1, 2, 1>} : memref<1x324x32xf32, #tpu.memory_space<vmem>>, vector<1x8x32xf32>
    %211 = vector.shape_cast %210 : vector<1x8x32xf32> to vector<8x32xf32>
    %c56_291 = arith.constant 56 : index
    %c224_292 = arith.constant 224 : index
    %212 = vector.load %arg7[%c56_291, %c224_292] : memref<64x288xf32, #tpu.memory_space<vmem>>, vector<8x32xf32>
    tpu.vector_store %arg7[%c56_291, %c224_292], %211 {strides = array<i32>} : memref<64x288xf32, #tpu.memory_space<vmem>>, vector<8x32xf32>,
    %c0_293 = arith.constant 0 : index
    %c290 = arith.constant 290 : index
    %c0_294 = arith.constant 0 : index
    %213 = tpu.strided_load %arg1[%c0_293, %c290, %c0_294] {strides = array<i32: 1, 2, 1>} : memref<1x324x32xf32, #tpu.memory_space<vmem>>, vector<1x8x32xf32>
    %214 = vector.shape_cast %213 : vector<1x8x32xf32> to vector<8x32xf32>
    %c56_295 = arith.constant 56 : index
    %c256_296 = arith.constant 256 : index
    %215 = vector.load %arg7[%c56_295, %c256_296] : memref<64x288xf32, #tpu.memory_space<vmem>>, vector<8x32xf32>
    tpu.vector_store %arg7[%c56_295, %c256_296], %214 {strides = array<i32>} : memref<64x288xf32, #tpu.memory_space<vmem>>, vector<8x32xf32>,
    %c0_297 = arith.constant 0 : index
    %c0_298 = arith.constant 0 : index
    %216 = vector.load %arg7[%c0_297, %c0_298] : memref<64x288xf32, #tpu.memory_space<vmem>>, vector<64x288xf32>
    %c0_299 = arith.constant 0 : index
    %c0_300 = arith.constant 0 : index
    %217 = vector.load %arg2[%c0_299, %c0_300] : memref<288x32xf32, #tpu.memory_space<vmem>>, vector<288x32xf32>
    %cst = arith.constant dense<0.000000e+00> : vector<64x32xf32>
    %218 = tpu.matmul %216, %217, %cst {dimension_numbers = #tpu.dot_dimension_numbers<[1], [0], [0], [1], [0, 0, 1, 1], [], []>} : vector<64x288xf32>, vector<288x32xf32>, vector<64x32xf32> -> vector<64x32xf32>
    %cst_301 = arith.constant 0.000000e+00 : f32
    %219 = vector.broadcast %cst_301 : f32 to vector<64x32xf32>
    %220 = arith.cmpf oge, %218, %219 : vector<64x32xf32>
    %cst_302 = arith.constant 2.000000e-01 : f32
    %221 = vector.broadcast %cst_302 : f32 to vector<64x32xf32>
    %222 = arith.mulf %221, %218 : vector<64x32xf32>
    %223 = arith.select %220, %218, %222 : vector<64x32xi1>, vector<64x32xf32>
    %cst_303 = arith.constant 0.000000e+00 : f32
    %224 = vector.broadcast %cst_303 : f32 to vector<100x32xf32>
    %c0_304 = arith.constant 0 : index
    %c0_305 = arith.constant 0 : index
    %225 = vector.load %arg6[%c0_304, %c0_305] : memref<100x32xf32, #tpu.memory_space<vmem>>, vector<100x32xf32>
    tpu.vector_store %arg6[%c0_304, %c0_305], %224 {strides = array<i32>} : memref<100x32xf32, #tpu.memory_space<vmem>>, vector<100x32xf32>,
    %226 = vector.extract_strided_slice %223 {offsets = [0, 0], sizes = [8, 32], strides = [1, 1]} : vector<64x32xf32> to vector<8x32xf32>
    %c11 = arith.constant 11 : index
    %c0_306 = arith.constant 0 : index
    %227 = vector.load %arg6[%c11, %c0_306] : memref<100x32xf32, #tpu.memory_space<vmem>>, vector<8x32xf32>
    tpu.vector_store %arg6[%c11, %c0_306], %226 {strides = array<i32>} : memref<100x32xf32, #tpu.memory_space<vmem>>, vector<8x32xf32>,
    %228 = vector.extract_strided_slice %223 {offsets = [8, 0], sizes = [8, 32], strides = [1, 1]} : vector<64x32xf32> to vector<8x32xf32>
    %c21 = arith.constant 21 : index
    %c0_307 = arith.constant 0 : index
    %229 = vector.load %arg6[%c21, %c0_307] : memref<100x32xf32, #tpu.memory_space<vmem>>, vector<8x32xf32>
    tpu.vector_store %arg6[%c21, %c0_307], %228 {strides = array<i32>} : memref<100x32xf32, #tpu.memory_space<vmem>>, vector<8x32xf32>,
    %230 = vector.extract_strided_slice %223 {offsets = [16, 0], sizes = [8, 32], strides = [1, 1]} : vector<64x32xf32> to vector<8x32xf32>
    %c31 = arith.constant 31 : index
    %c0_308 = arith.constant 0 : index
    %231 = vector.load %arg6[%c31, %c0_308] : memref<100x32xf32, #tpu.memory_space<vmem>>, vector<8x32xf32>
    tpu.vector_store %arg6[%c31, %c0_308], %230 {strides = array<i32>} : memref<100x32xf32, #tpu.memory_space<vmem>>, vector<8x32xf32>,
    %232 = vector.extract_strided_slice %223 {offsets = [24, 0], sizes = [8, 32], strides = [1, 1]} : vector<64x32xf32> to vector<8x32xf32>
    %c41 = arith.constant 41 : index
    %c0_309 = arith.constant 0 : index
    %233 = vector.load %arg6[%c41, %c0_309] : memref<100x32xf32, #tpu.memory_space<vmem>>, vector<8x32xf32>
    tpu.vector_store %arg6[%c41, %c0_309], %232 {strides = array<i32>} : memref<100x32xf32, #tpu.memory_space<vmem>>, vector<8x32xf32>,
    %234 = vector.extract_strided_slice %223 {offsets = [32, 0], sizes = [8, 32], strides = [1, 1]} : vector<64x32xf32> to vector<8x32xf32>
    %c51 = arith.constant 51 : index
    %c0_310 = arith.constant 0 : index
    %235 = vector.load %arg6[%c51, %c0_310] : memref<100x32xf32, #tpu.memory_space<vmem>>, vector<8x32xf32>
    tpu.vector_store %arg6[%c51, %c0_310], %234 {strides = array<i32>} : memref<100x32xf32, #tpu.memory_space<vmem>>, vector<8x32xf32>,
    %236 = vector.extract_strided_slice %223 {offsets = [40, 0], sizes = [8, 32], strides = [1, 1]} : vector<64x32xf32> to vector<8x32xf32>
    %c61 = arith.constant 61 : index
    %c0_311 = arith.constant 0 : index
    %237 = vector.load %arg6[%c61, %c0_311] : memref<100x32xf32, #tpu.memory_space<vmem>>, vector<8x32xf32>
    tpu.vector_store %arg6[%c61, %c0_311], %236 {strides = array<i32>} : memref<100x32xf32, #tpu.memory_space<vmem>>, vector<8x32xf32>,
    %238 = vector.extract_strided_slice %223 {offsets = [48, 0], sizes = [8, 32], strides = [1, 1]} : vector<64x32xf32> to vector<8x32xf32>
    %c71 = arith.constant 71 : index
    %c0_312 = arith.constant 0 : index
    %239 = vector.load %arg6[%c71, %c0_312] : memref<100x32xf32, #tpu.memory_space<vmem>>, vector<8x32xf32>
    tpu.vector_store %arg6[%c71, %c0_312], %238 {strides = array<i32>} : memref<100x32xf32, #tpu.memory_space<vmem>>, vector<8x32xf32>,
    %240 = vector.extract_strided_slice %223 {offsets = [56, 0], sizes = [8, 32], strides = [1, 1]} : vector<64x32xf32> to vector<8x32xf32>
    %c81 = arith.constant 81 : index
    %c0_313 = arith.constant 0 : index
    %241 = vector.load %arg6[%c81, %c0_313] : memref<100x32xf32, #tpu.memory_space<vmem>>, vector<8x32xf32>
    tpu.vector_store %arg6[%c81, %c0_313], %240 {strides = array<i32>} : memref<100x32xf32, #tpu.memory_space<vmem>>, vector<8x32xf32>,
    %c0_314 = arith.constant 0 : index
    %c0_315 = arith.constant 0 : index
    %242 = tpu.strided_load %arg6[%c0_314, %c0_315] {strides = array<i32: 2, 1>} : memref<100x32xf32, #tpu.memory_space<vmem>>, vector<4x32xf32>
    %c0_316 = arith.constant 0 : index
    %c0_317 = arith.constant 0 : index
    %243 = vector.load %arg8[%c0_316, %c0_317] : memref<16x288xf32, #tpu.memory_space<vmem>>, vector<4x32xf32>
    tpu.vector_store %arg8[%c0_316, %c0_317], %242 {strides = array<i32>} : memref<16x288xf32, #tpu.memory_space<vmem>>, vector<4x32xf32>,
    %c1_318 = arith.constant 1 : index
    %c0_319 = arith.constant 0 : index
    %244 = tpu.strided_load %arg6[%c1_318, %c0_319] {strides = array<i32: 2, 1>} : memref<100x32xf32, #tpu.memory_space<vmem>>, vector<4x32xf32>
    %c0_320 = arith.constant 0 : index
    %c32_321 = arith.constant 32 : index
    %245 = vector.load %arg8[%c0_320, %c32_321] : memref<16x288xf32, #tpu.memory_space<vmem>>, vector<4x32xf32>
    tpu.vector_store %arg8[%c0_320, %c32_321], %244 {strides = array<i32>} : memref<16x288xf32, #tpu.memory_space<vmem>>, vector<4x32xf32>,
    %c2_322 = arith.constant 2 : index
    %c0_323 = arith.constant 0 : index
    %246 = tpu.strided_load %arg6[%c2_322, %c0_323] {strides = array<i32: 2, 1>} : memref<100x32xf32, #tpu.memory_space<vmem>>, vector<4x32xf32>
    %c0_324 = arith.constant 0 : index
    %c64_325 = arith.constant 64 : index
    %247 = vector.load %arg8[%c0_324, %c64_325] : memref<16x288xf32, #tpu.memory_space<vmem>>, vector<4x32xf32>
    tpu.vector_store %arg8[%c0_324, %c64_325], %246 {strides = array<i32>} : memref<16x288xf32, #tpu.memory_space<vmem>>, vector<4x32xf32>,
    %c10 = arith.constant 10 : index
    %c0_326 = arith.constant 0 : index
    %248 = tpu.strided_load %arg6[%c10, %c0_326] {strides = array<i32: 2, 1>} : memref<100x32xf32, #tpu.memory_space<vmem>>, vector<4x32xf32>
    %c0_327 = arith.constant 0 : index
    %c96_328 = arith.constant 96 : index
    %249 = vector.load %arg8[%c0_327, %c96_328] : memref<16x288xf32, #tpu.memory_space<vmem>>, vector<4x32xf32>
    tpu.vector_store %arg8[%c0_327, %c96_328], %248 {strides = array<i32>} : memref<16x288xf32, #tpu.memory_space<vmem>>, vector<4x32xf32>,
    %c11_329 = arith.constant 11 : index
    %c0_330 = arith.constant 0 : index
    %250 = tpu.strided_load %arg6[%c11_329, %c0_330] {strides = array<i32: 2, 1>} : memref<100x32xf32, #tpu.memory_space<vmem>>, vector<4x32xf32>
    %c0_331 = arith.constant 0 : index
    %c128_332 = arith.constant 128 : index
    %251 = vector.load %arg8[%c0_331, %c128_332] : memref<16x288xf32, #tpu.memory_space<vmem>>, vector<4x32xf32>
    tpu.vector_store %arg8[%c0_331, %c128_332], %250 {strides = array<i32>} : memref<16x288xf32, #tpu.memory_space<vmem>>, vector<4x32xf32>,
    %c12 = arith.constant 12 : index
    %c0_333 = arith.constant 0 : index
    %252 = tpu.strided_load %arg6[%c12, %c0_333] {strides = array<i32: 2, 1>} : memref<100x32xf32, #tpu.memory_space<vmem>>, vector<4x32xf32>
    %c0_334 = arith.constant 0 : index
    %c160_335 = arith.constant 160 : index
    %253 = vector.load %arg8[%c0_334, %c160_335] : memref<16x288xf32, #tpu.memory_space<vmem>>, vector<4x32xf32>
    tpu.vector_store %arg8[%c0_334, %c160_335], %252 {strides = array<i32>} : memref<16x288xf32, #tpu.memory_space<vmem>>, vector<4x32xf32>,
    %c20_336 = arith.constant 20 : index
    %c0_337 = arith.constant 0 : index
    %254 = tpu.strided_load %arg6[%c20_336, %c0_337] {strides = array<i32: 2, 1>} : memref<100x32xf32, #tpu.memory_space<vmem>>, vector<4x32xf32>
    %c0_338 = arith.constant 0 : index
    %c192_339 = arith.constant 192 : index
    %255 = vector.load %arg8[%c0_338, %c192_339] : memref<16x288xf32, #tpu.memory_space<vmem>>, vector<4x32xf32>
    tpu.vector_store %arg8[%c0_338, %c192_339], %254 {strides = array<i32>} : memref<16x288xf32, #tpu.memory_space<vmem>>, vector<4x32xf32>,
    %c21_340 = arith.constant 21 : index
    %c0_341 = arith.constant 0 : index
    %256 = tpu.strided_load %arg6[%c21_340, %c0_341] {strides = array<i32: 2, 1>} : memref<100x32xf32, #tpu.memory_space<vmem>>, vector<4x32xf32>
    %c0_342 = arith.constant 0 : index
    %c224_343 = arith.constant 224 : index
    %257 = vector.load %arg8[%c0_342, %c224_343] : memref<16x288xf32, #tpu.memory_space<vmem>>, vector<4x32xf32>
    tpu.vector_store %arg8[%c0_342, %c224_343], %256 {strides = array<i32>} : memref<16x288xf32, #tpu.memory_space<vmem>>, vector<4x32xf32>,
    %c22 = arith.constant 22 : index
    %c0_344 = arith.constant 0 : index
    %258 = tpu.strided_load %arg6[%c22, %c0_344] {strides = array<i32: 2, 1>} : memref<100x32xf32, #tpu.memory_space<vmem>>, vector<4x32xf32>
    %c0_345 = arith.constant 0 : index
    %c256_346 = arith.constant 256 : index
    %259 = vector.load %arg8[%c0_345, %c256_346] : memref<16x288xf32, #tpu.memory_space<vmem>>, vector<4x32xf32>
    tpu.vector_store %arg8[%c0_345, %c256_346], %258 {strides = array<i32>} : memref<16x288xf32, #tpu.memory_space<vmem>>, vector<4x32xf32>,
    %c20_347 = arith.constant 20 : index
    %c0_348 = arith.constant 0 : index
    %260 = tpu.strided_load %arg6[%c20_347, %c0_348] {strides = array<i32: 2, 1>} : memref<100x32xf32, #tpu.memory_space<vmem>>, vector<4x32xf32>
    %c4 = arith.constant 4 : index
    %c0_349 = arith.constant 0 : index
    %261 = vector.load %arg8[%c4, %c0_349] : memref<16x288xf32, #tpu.memory_space<vmem>>, vector<4x32xf32>
    tpu.vector_store %arg8[%c4, %c0_349], %260 {strides = array<i32>} : memref<16x288xf32, #tpu.memory_space<vmem>>, vector<4x32xf32>,
    %c21_350 = arith.constant 21 : index
    %c0_351 = arith.constant 0 : index
    %262 = tpu.strided_load %arg6[%c21_350, %c0_351] {strides = array<i32: 2, 1>} : memref<100x32xf32, #tpu.memory_space<vmem>>, vector<4x32xf32>
    %c4_352 = arith.constant 4 : index
    %c32_353 = arith.constant 32 : index
    %263 = vector.load %arg8[%c4_352, %c32_353] : memref<16x288xf32, #tpu.memory_space<vmem>>, vector<4x32xf32>
    tpu.vector_store %arg8[%c4_352, %c32_353], %262 {strides = array<i32>} : memref<16x288xf32, #tpu.memory_space<vmem>>, vector<4x32xf32>,
    %c22_354 = arith.constant 22 : index
    %c0_355 = arith.constant 0 : index
    %264 = tpu.strided_load %arg6[%c22_354, %c0_355] {strides = array<i32: 2, 1>} : memref<100x32xf32, #tpu.memory_space<vmem>>, vector<4x32xf32>
    %c4_356 = arith.constant 4 : index
    %c64_357 = arith.constant 64 : index
    %265 = vector.load %arg8[%c4_356, %c64_357] : memref<16x288xf32, #tpu.memory_space<vmem>>, vector<4x32xf32>
    tpu.vector_store %arg8[%c4_356, %c64_357], %264 {strides = array<i32>} : memref<16x288xf32, #tpu.memory_space<vmem>>, vector<4x32xf32>,
    %c30 = arith.constant 30 : index
    %c0_358 = arith.constant 0 : index
    %266 = tpu.strided_load %arg6[%c30, %c0_358] {strides = array<i32: 2, 1>} : memref<100x32xf32, #tpu.memory_space<vmem>>, vector<4x32xf32>
    %c4_359 = arith.constant 4 : index
    %c96_360 = arith.constant 96 : index
    %267 = vector.load %arg8[%c4_359, %c96_360] : memref<16x288xf32, #tpu.memory_space<vmem>>, vector<4x32xf32>
    tpu.vector_store %arg8[%c4_359, %c96_360], %266 {strides = array<i32>} : memref<16x288xf32, #tpu.memory_space<vmem>>, vector<4x32xf32>,
    %c31_361 = arith.constant 31 : index
    %c0_362 = arith.constant 0 : index
    %268 = tpu.strided_load %arg6[%c31_361, %c0_362] {strides = array<i32: 2, 1>} : memref<100x32xf32, #tpu.memory_space<vmem>>, vector<4x32xf32>
    %c4_363 = arith.constant 4 : index
    %c128_364 = arith.constant 128 : index
    %269 = vector.load %arg8[%c4_363, %c128_364] : memref<16x288xf32, #tpu.memory_space<vmem>>, vector<4x32xf32>
    tpu.vector_store %arg8[%c4_363, %c128_364], %268 {strides = array<i32>} : memref<16x288xf32, #tpu.memory_space<vmem>>, vector<4x32xf32>,
    %c32_365 = arith.constant 32 : index
    %c0_366 = arith.constant 0 : index
    %270 = tpu.strided_load %arg6[%c32_365, %c0_366] {strides = array<i32: 2, 1>} : memref<100x32xf32, #tpu.memory_space<vmem>>, vector<4x32xf32>
    %c4_367 = arith.constant 4 : index
    %c160_368 = arith.constant 160 : index
    %271 = vector.load %arg8[%c4_367, %c160_368] : memref<16x288xf32, #tpu.memory_space<vmem>>, vector<4x32xf32>
    tpu.vector_store %arg8[%c4_367, %c160_368], %270 {strides = array<i32>} : memref<16x288xf32, #tpu.memory_space<vmem>>, vector<4x32xf32>,
    %c40_369 = arith.constant 40 : index
    %c0_370 = arith.constant 0 : index
    %272 = tpu.strided_load %arg6[%c40_369, %c0_370] {strides = array<i32: 2, 1>} : memref<100x32xf32, #tpu.memory_space<vmem>>, vector<4x32xf32>
    %c4_371 = arith.constant 4 : index
    %c192_372 = arith.constant 192 : index
    %273 = vector.load %arg8[%c4_371, %c192_372] : memref<16x288xf32, #tpu.memory_space<vmem>>, vector<4x32xf32>
    tpu.vector_store %arg8[%c4_371, %c192_372], %272 {strides = array<i32>} : memref<16x288xf32, #tpu.memory_space<vmem>>, vector<4x32xf32>,
    %c41_373 = arith.constant 41 : index
    %c0_374 = arith.constant 0 : index
    %274 = tpu.strided_load %arg6[%c41_373, %c0_374] {strides = array<i32: 2, 1>} : memref<100x32xf32, #tpu.memory_space<vmem>>, vector<4x32xf32>
    %c4_375 = arith.constant 4 : index
    %c224_376 = arith.constant 224 : index
    %275 = vector.load %arg8[%c4_375, %c224_376] : memref<16x288xf32, #tpu.memory_space<vmem>>, vector<4x32xf32>
    tpu.vector_store %arg8[%c4_375, %c224_376], %274 {strides = array<i32>} : memref<16x288xf32, #tpu.memory_space<vmem>>, vector<4x32xf32>,
    %c42 = arith.constant 42 : index
    %c0_377 = arith.constant 0 : index
    %276 = tpu.strided_load %arg6[%c42, %c0_377] {strides = array<i32: 2, 1>} : memref<100x32xf32, #tpu.memory_space<vmem>>, vector<4x32xf32>
    %c4_378 = arith.constant 4 : index
    %c256_379 = arith.constant 256 : index
    %277 = vector.load %arg8[%c4_378, %c256_379] : memref<16x288xf32, #tpu.memory_space<vmem>>, vector<4x32xf32>
    tpu.vector_store %arg8[%c4_378, %c256_379], %276 {strides = array<i32>} : memref<16x288xf32, #tpu.memory_space<vmem>>, vector<4x32xf32>,
    %c40_380 = arith.constant 40 : index
    %c0_381 = arith.constant 0 : index
    %278 = tpu.strided_load %arg6[%c40_380, %c0_381] {strides = array<i32: 2, 1>} : memref<100x32xf32, #tpu.memory_space<vmem>>, vector<4x32xf32>
    %c8_382 = arith.constant 8 : index
    %c0_383 = arith.constant 0 : index
    %279 = vector.load %arg8[%c8_382, %c0_383] : memref<16x288xf32, #tpu.memory_space<vmem>>, vector<4x32xf32>
    tpu.vector_store %arg8[%c8_382, %c0_383], %278 {strides = array<i32>} : memref<16x288xf32, #tpu.memory_space<vmem>>, vector<4x32xf32>,
    %c41_384 = arith.constant 41 : index
    %c0_385 = arith.constant 0 : index
    %280 = tpu.strided_load %arg6[%c41_384, %c0_385] {strides = array<i32: 2, 1>} : memref<100x32xf32, #tpu.memory_space<vmem>>, vector<4x32xf32>
    %c8_386 = arith.constant 8 : index
    %c32_387 = arith.constant 32 : index
    %281 = vector.load %arg8[%c8_386, %c32_387] : memref<16x288xf32, #tpu.memory_space<vmem>>, vector<4x32xf32>
    tpu.vector_store %arg8[%c8_386, %c32_387], %280 {strides = array<i32>} : memref<16x288xf32, #tpu.memory_space<vmem>>, vector<4x32xf32>,
    %c42_388 = arith.constant 42 : index
    %c0_389 = arith.constant 0 : index
    %282 = tpu.strided_load %arg6[%c42_388, %c0_389] {strides = array<i32: 2, 1>} : memref<100x32xf32, #tpu.memory_space<vmem>>, vector<4x32xf32>
    %c8_390 = arith.constant 8 : index
    %c64_391 = arith.constant 64 : index
    %283 = vector.load %arg8[%c8_390, %c64_391] : memref<16x288xf32, #tpu.memory_space<vmem>>, vector<4x32xf32>
    tpu.vector_store %arg8[%c8_390, %c64_391], %282 {strides = array<i32>} : memref<16x288xf32, #tpu.memory_space<vmem>>, vector<4x32xf32>,
    %c50 = arith.constant 50 : index
    %c0_392 = arith.constant 0 : index
    %284 = tpu.strided_load %arg6[%c50, %c0_392] {strides = array<i32: 2, 1>} : memref<100x32xf32, #tpu.memory_space<vmem>>, vector<4x32xf32>
    %c8_393 = arith.constant 8 : index
    %c96_394 = arith.constant 96 : index
    %285 = vector.load %arg8[%c8_393, %c96_394] : memref<16x288xf32, #tpu.memory_space<vmem>>, vector<4x32xf32>
    tpu.vector_store %arg8[%c8_393, %c96_394], %284 {strides = array<i32>} : memref<16x288xf32, #tpu.memory_space<vmem>>, vector<4x32xf32>,
    %c51_395 = arith.constant 51 : index
    %c0_396 = arith.constant 0 : index
    %286 = tpu.strided_load %arg6[%c51_395, %c0_396] {strides = array<i32: 2, 1>} : memref<100x32xf32, #tpu.memory_space<vmem>>, vector<4x32xf32>
    %c8_397 = arith.constant 8 : index
    %c128_398 = arith.constant 128 : index
    %287 = vector.load %arg8[%c8_397, %c128_398] : memref<16x288xf32, #tpu.memory_space<vmem>>, vector<4x32xf32>
    tpu.vector_store %arg8[%c8_397, %c128_398], %286 {strides = array<i32>} : memref<16x288xf32, #tpu.memory_space<vmem>>, vector<4x32xf32>,
    %c52 = arith.constant 52 : index
    %c0_399 = arith.constant 0 : index
    %288 = tpu.strided_load %arg6[%c52, %c0_399] {strides = array<i32: 2, 1>} : memref<100x32xf32, #tpu.memory_space<vmem>>, vector<4x32xf32>
    %c8_400 = arith.constant 8 : index
    %c160_401 = arith.constant 160 : index
    %289 = vector.load %arg8[%c8_400, %c160_401] : memref<16x288xf32, #tpu.memory_space<vmem>>, vector<4x32xf32>
    tpu.vector_store %arg8[%c8_400, %c160_401], %288 {strides = array<i32>} : memref<16x288xf32, #tpu.memory_space<vmem>>, vector<4x32xf32>,
    %c60 = arith.constant 60 : index
    %c0_402 = arith.constant 0 : index
    %290 = tpu.strided_load %arg6[%c60, %c0_402] {strides = array<i32: 2, 1>} : memref<100x32xf32, #tpu.memory_space<vmem>>, vector<4x32xf32>
    %c8_403 = arith.constant 8 : index
    %c192_404 = arith.constant 192 : index
    %291 = vector.load %arg8[%c8_403, %c192_404] : memref<16x288xf32, #tpu.memory_space<vmem>>, vector<4x32xf32>
    tpu.vector_store %arg8[%c8_403, %c192_404], %290 {strides = array<i32>} : memref<16x288xf32, #tpu.memory_space<vmem>>, vector<4x32xf32>,
    %c61_405 = arith.constant 61 : index
    %c0_406 = arith.constant 0 : index
    %292 = tpu.strided_load %arg6[%c61_405, %c0_406] {strides = array<i32: 2, 1>} : memref<100x32xf32, #tpu.memory_space<vmem>>, vector<4x32xf32>
    %c8_407 = arith.constant 8 : index
    %c224_408 = arith.constant 224 : index
    %293 = vector.load %arg8[%c8_407, %c224_408] : memref<16x288xf32, #tpu.memory_space<vmem>>, vector<4x32xf32>
    tpu.vector_store %arg8[%c8_407, %c224_408], %292 {strides = array<i32>} : memref<16x288xf32, #tpu.memory_space<vmem>>, vector<4x32xf32>,
    %c62 = arith.constant 62 : index
    %c0_409 = arith.constant 0 : index
    %294 = tpu.strided_load %arg6[%c62, %c0_409] {strides = array<i32: 2, 1>} : memref<100x32xf32, #tpu.memory_space<vmem>>, vector<4x32xf32>
    %c8_410 = arith.constant 8 : index
    %c256_411 = arith.constant 256 : index
    %295 = vector.load %arg8[%c8_410, %c256_411] : memref<16x288xf32, #tpu.memory_space<vmem>>, vector<4x32xf32>
    tpu.vector_store %arg8[%c8_410, %c256_411], %294 {strides = array<i32>} : memref<16x288xf32, #tpu.memory_space<vmem>>, vector<4x32xf32>,
    %c60_412 = arith.constant 60 : index
    %c0_413 = arith.constant 0 : index
    %296 = tpu.strided_load %arg6[%c60_412, %c0_413] {strides = array<i32: 2, 1>} : memref<100x32xf32, #tpu.memory_space<vmem>>, vector<4x32xf32>
    %c12_414 = arith.constant 12 : index
    %c0_415 = arith.constant 0 : index
    %297 = vector.load %arg8[%c12_414, %c0_415] : memref<16x288xf32, #tpu.memory_space<vmem>>, vector<4x32xf32>
    tpu.vector_store %arg8[%c12_414, %c0_415], %296 {strides = array<i32>} : memref<16x288xf32, #tpu.memory_space<vmem>>, vector<4x32xf32>,
    %c61_416 = arith.constant 61 : index
    %c0_417 = arith.constant 0 : index
    %298 = tpu.strided_load %arg6[%c61_416, %c0_417] {strides = array<i32: 2, 1>} : memref<100x32xf32, #tpu.memory_space<vmem>>, vector<4x32xf32>
    %c12_418 = arith.constant 12 : index
    %c32_419 = arith.constant 32 : index
    %299 = vector.load %arg8[%c12_418, %c32_419] : memref<16x288xf32, #tpu.memory_space<vmem>>, vector<4x32xf32>
    tpu.vector_store %arg8[%c12_418, %c32_419], %298 {strides = array<i32>} : memref<16x288xf32, #tpu.memory_space<vmem>>, vector<4x32xf32>,
    %c62_420 = arith.constant 62 : index
    %c0_421 = arith.constant 0 : index
    %300 = tpu.strided_load %arg6[%c62_420, %c0_421] {strides = array<i32: 2, 1>} : memref<100x32xf32, #tpu.memory_space<vmem>>, vector<4x32xf32>
    %c12_422 = arith.constant 12 : index
    %c64_423 = arith.constant 64 : index
    %301 = vector.load %arg8[%c12_422, %c64_423] : memref<16x288xf32, #tpu.memory_space<vmem>>, vector<4x32xf32>
    tpu.vector_store %arg8[%c12_422, %c64_423], %300 {strides = array<i32>} : memref<16x288xf32, #tpu.memory_space<vmem>>, vector<4x32xf32>,
    %c70 = arith.constant 70 : index
    %c0_424 = arith.constant 0 : index
    %302 = tpu.strided_load %arg6[%c70, %c0_424] {strides = array<i32: 2, 1>} : memref<100x32xf32, #tpu.memory_space<vmem>>, vector<4x32xf32>
    %c12_425 = arith.constant 12 : index
    %c96_426 = arith.constant 96 : index
    %303 = vector.load %arg8[%c12_425, %c96_426] : memref<16x288xf32, #tpu.memory_space<vmem>>, vector<4x32xf32>
    tpu.vector_store %arg8[%c12_425, %c96_426], %302 {strides = array<i32>} : memref<16x288xf32, #tpu.memory_space<vmem>>, vector<4x32xf32>,
    %c71_427 = arith.constant 71 : index
    %c0_428 = arith.constant 0 : index
    %304 = tpu.strided_load %arg6[%c71_427, %c0_428] {strides = array<i32: 2, 1>} : memref<100x32xf32, #tpu.memory_space<vmem>>, vector<4x32xf32>
    %c12_429 = arith.constant 12 : index
    %c128_430 = arith.constant 128 : index
    %305 = vector.load %arg8[%c12_429, %c128_430] : memref<16x288xf32, #tpu.memory_space<vmem>>, vector<4x32xf32>
    tpu.vector_store %arg8[%c12_429, %c128_430], %304 {strides = array<i32>} : memref<16x288xf32, #tpu.memory_space<vmem>>, vector<4x32xf32>,
    %c72_431 = arith.constant 72 : index
    %c0_432 = arith.constant 0 : index
    %306 = tpu.strided_load %arg6[%c72_431, %c0_432] {strides = array<i32: 2, 1>} : memref<100x32xf32, #tpu.memory_space<vmem>>, vector<4x32xf32>
    %c12_433 = arith.constant 12 : index
    %c160_434 = arith.constant 160 : index
    %307 = vector.load %arg8[%c12_433, %c160_434] : memref<16x288xf32, #tpu.memory_space<vmem>>, vector<4x32xf32>
    tpu.vector_store %arg8[%c12_433, %c160_434], %306 {strides = array<i32>} : memref<16x288xf32, #tpu.memory_space<vmem>>, vector<4x32xf32>,
    %c80 = arith.constant 80 : index
    %c0_435 = arith.constant 0 : index
    %308 = tpu.strided_load %arg6[%c80, %c0_435] {strides = array<i32: 2, 1>} : memref<100x32xf32, #tpu.memory_space<vmem>>, vector<4x32xf32>
    %c12_436 = arith.constant 12 : index
    %c192_437 = arith.constant 192 : index
    %309 = vector.load %arg8[%c12_436, %c192_437] : memref<16x288xf32, #tpu.memory_space<vmem>>, vector<4x32xf32>
    tpu.vector_store %arg8[%c12_436, %c192_437], %308 {strides = array<i32>} : memref<16x288xf32, #tpu.memory_space<vmem>>, vector<4x32xf32>,
    %c81_438 = arith.constant 81 : index
    %c0_439 = arith.constant 0 : index
    %310 = tpu.strided_load %arg6[%c81_438, %c0_439] {strides = array<i32: 2, 1>} : memref<100x32xf32, #tpu.memory_space<vmem>>, vector<4x32xf32>
    %c12_440 = arith.constant 12 : index
    %c224_441 = arith.constant 224 : index
    %311 = vector.load %arg8[%c12_440, %c224_441] : memref<16x288xf32, #tpu.memory_space<vmem>>, vector<4x32xf32>
    tpu.vector_store %arg8[%c12_440, %c224_441], %310 {strides = array<i32>} : memref<16x288xf32, #tpu.memory_space<vmem>>, vector<4x32xf32>,
    %c82 = arith.constant 82 : index
    %c0_442 = arith.constant 0 : index
    %312 = tpu.strided_load %arg6[%c82, %c0_442] {strides = array<i32: 2, 1>} : memref<100x32xf32, #tpu.memory_space<vmem>>, vector<4x32xf32>
    %c12_443 = arith.constant 12 : index
    %c256_444 = arith.constant 256 : index
    %313 = vector.load %arg8[%c12_443, %c256_444] : memref<16x288xf32, #tpu.memory_space<vmem>>, vector<4x32xf32>
    tpu.vector_store %arg8[%c12_443, %c256_444], %312 {strides = array<i32>} : memref<16x288xf32, #tpu.memory_space<vmem>>, vector<4x32xf32>,
    %c0_445 = arith.constant 0 : index
    %c0_446 = arith.constant 0 : index
    %314 = vector.load %arg8[%c0_445, %c0_446] : memref<16x288xf32, #tpu.memory_space<vmem>>, vector<16x288xf32>
    %c0_447 = arith.constant 0 : index
    %c0_448 = arith.constant 0 : index
    %315 = vector.load %arg3[%c0_447, %c0_448] : memref<288x32xf32, #tpu.memory_space<vmem>>, vector<288x32xf32>
    %cst_449 = arith.constant dense<0.000000e+00> : vector<16x32xf32>
    %316 = tpu.matmul %314, %315, %cst_449 {dimension_numbers = #tpu.dot_dimension_numbers<[1], [0], [0], [1], [0, 0, 1, 1], [], []>} : vector<16x288xf32>, vector<288x32xf32>, vector<16x32xf32> -> vector<16x32xf32>
    %cst_450 = arith.constant 0.000000e+00 : f32
    %317 = vector.broadcast %cst_450 : f32 to vector<16x32xf32>
    %318 = arith.cmpf oge, %316, %317 : vector<16x32xf32>
    %cst_451 = arith.constant 2.000000e-01 : f32
    %319 = vector.broadcast %cst_451 : f32 to vector<16x32xf32>
    %320 = arith.mulf %319, %316 : vector<16x32xf32>
    %321 = arith.select %318, %316, %320 : vector<16x32xi1>, vector<16x32xf32>
    %cst_452 = arith.constant dense<0.000000e+00> : vector<32xf32>
    %322 = vector.multi_reduction <add>, %321, %cst_452 [0] : vector<16x32xf32> to vector<32xf32>
    %323 = vector.shape_cast %322 : vector<32xf32> to vector<1x32xf32>
    %cst_453 = arith.constant 6.250000e-02 : f32
    %324 = vector.broadcast %cst_453 : f32 to vector<1x32xf32>
    %325 = arith.mulf %323, %324 : vector<1x32xf32>
    %c0_454 = arith.constant 0 : index
    %c0_455 = arith.constant 0 : index
    %326 = vector.load %arg4[%c0_454, %c0_455] : memref<32x6xf32, #tpu.memory_space<vmem>>, vector<32x6xf32>
    %cst_456 = arith.constant dense<0.000000e+00> : vector<1x6xf32>
    %327 = tpu.matmul %325, %326, %cst_456 {dimension_numbers = #tpu.dot_dimension_numbers<[1], [0], [0], [1], [0, 0, 1, 1], [], []>} : vector<1x32xf32>, vector<32x6xf32>, vector<1x6xf32> -> vector<1x6xf32>
    %cst_457 = arith.constant 0.00999999977 : f32
    %328 = vector.broadcast %cst_457 : f32 to vector<1x6xf32>
    %329 = arith.mulf %328, %327 : vector<1x6xf32>
    %c0_458 = arith.constant 0 : index
    %c0_459 = arith.constant 0 : index
    %c0_460 = arith.constant 0 : index
    %330 = vector.load %arg5[%c0_458, %c0_459, %c0_460] : memref<1x1x6xf32, #tpu.memory_space<vmem>>, vector<1x1x6xf32>
    %331 = vector.shape_cast %330 : vector<1x1x6xf32> to vector<1x6xf32>
    %332 = vector.shape_cast %329 : vector<1x6xf32> to vector<1x1x6xf32>
    tpu.vector_store %arg5[%c0_458, %c0_459, %c0_460], %332 {strides = array<i32>} : memref<1x1x6xf32, #tpu.memory_space<vmem>>, vector<1x1x6xf32>,
    return
  }
  func.func @transform_0(%arg0: i32) -> (i32, i32, i32) {
    %c0_i32 = arith.constant 0 : i32
    %c0_i32_0 = arith.constant 0 : i32
    %c0_i32_1 = arith.constant 0 : i32
    return %arg0, %c0_i32, %c0_i32_0 : i32, i32, i32
  }
  func.func @transform_1(%arg0: i32) -> (i32, i32) {
    %c0_i32 = arith.constant 0 : i32
    %c0_i32_0 = arith.constant 0 : i32
    %c0_i32_1 = arith.constant 0 : i32
    return %c0_i32, %c0_i32_0 : i32, i32
  }
  func.func @transform_2(%arg0: i32) -> (i32, i32) {
    %c0_i32 = arith.constant 0 : i32
    %c0_i32_0 = arith.constant 0 : i32
    %c0_i32_1 = arith.constant 0 : i32
    return %c0_i32, %c0_i32_0 : i32, i32
  }
  func.func @transform_3(%arg0: i32) -> (i32, i32) {
    %c0_i32 = arith.constant 0 : i32
    %c0_i32_0 = arith.constant 0 : i32
    %c0_i32_1 = arith.constant 0 : i32
    return %c0_i32, %c0_i32_0 : i32, i32
  }
  func.func @transform_4(%arg0: i32) -> (i32, i32, i32) {
    %c0_i32 = arith.constant 0 : i32
    %c0_i32_0 = arith.constant 0 : i32
    %c0_i32_1 = arith.constant 0 : i32
    return %arg0, %c0_i32, %c0_i32_0 : i32, i32, i32
  }
}

</mosaic_0001>

<bundles_post_ra>
// kernel: pose_decoder_forward.1
= control target key start
LH: loop header
LB: loop body
LE: loop exit
PB: predicated region body
PF: predicated region fallthrough
CT: control target
= control target key end

     0   :  { %s1797_s15 = smov 0   ;;  %s2350_s0 = inlined_call_operand.vmem [shape: f32[2,324,32], index: 0, kind: input, shape index: {}]   ;;  %s2351_s1 = inlined_call_operand.vmem [shape: f32[288,32], index: 1, kind: input, shape index: {}]   ;;  %s2352_s2 = inlined_call_operand.vmem [shape: f32[288,32], index: 2, kind: input, shape index: {}]   ;;  %s2353_s3 = inlined_call_operand.vmem [shape: f32[32,6], index: 3, kind: input, shape index: {}]   ;;  %s2354_s4 = inlined_call_operand.vmem [shape: f32[2,1,6], index: 4, kind: output, shape index: {}]  }
   0x1 LB: > { %s1496_s16 = sadd.s32 4294967295, %s1765_s15   ;;  %p1500_p0 = scmp.ge.s32.totalorder %s1765_s15, 1  ;;  %s1765_s15 = sphi %s1797_s15, %s14_s15  }
   0x2   : > { %p162_p1 = scmp.lt.s32.totalorder %s1765_s15, 3 }
   0x4   : > { %p163_p2 = pnand %p1500_p0, %p162_p1 }
   0x5   : > { %p186_p3 = scmp.lt.s32.totalorder (!%p163_p2), %s1496_s16, 1  ;;  %s1767_s13 = smov (!%p163_p2), 32  }
   0x6   : > { %166 = sbr.rel (%p163_p2) target bundleno = 992 (0x3e0), region = 36  ;;  %s1768_s14 = smov (!%p163_p2), 64  }
   0xb   : > { %v639_v0 = vld [vmem:[%s2351_s1 + $0xf8] sm:$0xff]  ;;  %v638_v2 = vld [vmem:[%s2351_s1 + $0xf0] sm:$0xff]  ;;  %s2356_s16 = smov (!%p186_p3, %s1496_s16), 1  ;;  %v637_v4 = vld [vmem:[%s2351_s1 + $0xe8] sm:$0xff]  ;;  %vm195_vm0 = vcmask 261120   ;;  %vm203_vm1 = vcmask 523520  }
   0xc   : > { %v623_v1 = vld [vmem:[%s2351_s1 + $0x78] sm:$0xff]  ;;  %1586 = vmatprep.subr.mxu0 %v639_v0  ;;  %v622_v3 = vld [vmem:[%s2351_s1 + $0x70] sm:$0xff]  ;;  %v621_v5 = vld [vmem:[%s2351_s1 + $0x68] sm:$0xff]  ;;  %s1745_s29 = smul.u32 328, %s2356_s16  ;;  %vm211_vm2 = vcmask 785920   ;;  %vm219_vm3 = vcmask 1048320   ;;  %s193_s26 = scalar_lea.vmem %s2354_s4, %s2356_s16 }
   0xd   : > { %1587 = vmatpush3.msra.mxu0 %v623_v1  ;;  %v636_v6 = vld [vmem:[%s2351_s1 + $0xe0] sm:$0xff]  ;;  %v635_v10 = vld [vmem:[%s2351_s1 + $0xd8] sm:$0xff]  ;;  %v634_v14 = vld [vmem:[%s2351_s1 + $0xd0] sm:$0xff]  ;;  %vm914_vm4 = vcmask 257024   ;;  %vm932_vm5 = vcmask 519424   ;;  %vm940_vm6 = vcmask 781824  }
   0xe   : > { %1588 = vmatprep.subr.mxu0 %v638_v2  ;;  %s1832_s8 = scalar_lea.vmem %s2350_s0, %s1745_s29  ;;  %v620_v7 = vld [vmem:[%s2351_s1 + $0x60] sm:$0xff]  ;;  %v619_v11 = vld [vmem:[%s2351_s1 + $0x58] sm:$0xff]  ;;  %v618_v15 = vld [vmem:[%s2351_s1 + $0x50] sm:$0xff]  ;;  %s1769_s29 = smov 96   ;;  %vm981_vm10 = vcmask 261124  }
   0xf   : > { %1589 = vmatpush3.msra.mxu0 %v622_v3  ;;  %v1506_v8 = vld [vmem:[%s1832_s8 + $0x14] ss:$2 sm:$0xff]  ;;  %v1507_v9 = vld [vmem:[%s1832_s8 + $0x24] ss:$2 sm:$0xff]  ;;  %v1502_v12 = vld [vmem:[%s1832_s8 + $0x1] ss:$2 sm:$0xff] }
  0x10   : > { %1590 = vmatprep.subr.mxu0 %v637_v4  ;;  %227 = vrot.lane.b32.xlu0 %v1506_v8, %s1767_s13  ;;  %v1503_v13 = vld [vmem:[%s1832_s8 + $0x2] ss:$2 sm:$0xff]  ;;  %v1508_v17 = vld [vmem:[%s1832_s8 + $0x25] ss:$2 sm:$0xff]  ;;  %v1504_v18 = vld [vmem:[%s1832_s8 + $0x12] ss:$2 sm:$0xff] }
  0x11   : > { %1591 = vmatpush3.msra.mxu0 %v621_v5  ;;  %234 = vrot.lane.b32.xlu1 %v1507_v9, %s1768_s14  ;;  %v633_v16 = vld [vmem:[%s2351_s1 + $0xc8] sm:$0xff]  ;;  %v632_v20 = vld [vmem:[%s2351_s1 + $0xc0] sm:$0xff]  ;;  %v631_v24 = vld [vmem:[%s2351_s1 + $0xb8] sm:$0xff] }
  0x12   : > { %1592 = vmatprep.subr.mxu0 %v636_v6  ;;  %v617_v19 = vld [vmem:[%s2351_s1 + $0x48] sm:$0xff]  ;;  %v616_v21 = vld [vmem:[%s2351_s1 + $0x40] sm:$0xff]  ;;  %v615_v25 = vld [vmem:[%s2351_s1 + $0x38] sm:$0xff] }
  0x13   : > { %1593 = vmatpush3.msra.mxu0 %v620_v7  ;;  %v1515_v22 = vld [vmem:[%s1832_s8 + $0x38] ss:$2 sm:$0xff]  ;;  %v1511_v23 = vld [vmem:[%s1832_s8 + $0x25] ss:$2 sm:$0xff]  ;;  %v1516_v27 = vld [vmem:[%s1832_s8 + $0x48] ss:$2 sm:$0xff] }
  0x14   : > { %1594 = vmatprep.subr.mxu0 %v635_v10  ;;  %200 = vrot.lane.b32.xlu0 %v1502_v12, %s1767_s13  ;;  %v630_v26 = vld [vmem:[%s2351_s1 + $0xb0] sm:$0xff]  ;;  %v629_v30 = vld [vmem:[%s2351_s1 + $0xa8] sm:$0xff]  ;;  %v628_v36 = vld [vmem:[%s2351_s1 + $0xa0] sm:$0xff] }
  0x15   : > { %1595 = vmatpush3.msra.mxu0 %v619_v11  ;;  %208 = vrot.lane.b32.xlu1 %v1503_v13, %s1768_s14  ;;  %v1512_v28 = vld [vmem:[%s1832_s8 + $0x26] ss:$2 sm:$0xff]  ;;  %v1517_v31 = vld [vmem:[%s1832_s8 + $0x49] ss:$2 sm:$0xff]  ;;  %v1513_v33 = vld [vmem:[%s1832_s8 + $0x36] ss:$2 sm:$0xff] }
  0x16   : > { %1596 = vmatprep.subr.mxu0 %v634_v14  ;;  %v614_v29 = vld [vmem:[%s2351_s1 + $0x30] sm:$0xff]  ;;  %v194_v34 = vld [vmem:[%s1832_s8] ss:$2 sm:$0xff]  ;;  %v643_v38 = vld [vmem:[%s2351_s1 + $0x118] sm:$0xff] }
  0x17   : > { %1597 = vmatpush3.msra.mxu0 %v618_v15  ;;  %v1505_v32 = vld [vmem:[%s1832_s8 + $0x13] ss:$2 sm:$0xff]  ;;  %v613_v35 = vld [vmem:[%s2351_s1 + $0x28] sm:$0xff]  ;;  %196 = vst.msk [vmem:[#allocation3] sm:$0xff] %vm195_vm0, %v194_v34  ;;  %1703 = vmatprep.subr.mxu1 %v643_v38  ;;  %v1536_v60 = vld [vmem:[%s1832_s8 + $0x92] ss:$2 sm:$0xff] }
  0x18   : > { %1598 = vmatprep.subr.mxu0 %v633_v16  ;;  %241 = vrot.lane.b32.xlu0 %v1508_v17, %s1769_s29  ;;  %223 = vst.msk [vmem:[#allocation3 + $0x8] sm:$0xff] %vm195_vm0, %v1505_v32  ;;  %v612_v37 = vld [vmem:[%s2351_s1 + $0x20] sm:$0xff]  ;;  %v627_v40 = vld [vmem:[%s2351_s1 + $0x98] sm:$0xff]  ;;  %v1520_v43 = vld [vmem:[%s1832_s8 + $0x49] ss:$2 sm:$0xff] }
  0x19   : > { %216 = vrot.lane.b32.xlu1 %v1504_v18, %s1769_s29  ;;  %1599 = vmatpush3.msra.mxu0 %v617_v19  ;;  %v1514_v39 = vld [vmem:[%s1832_s8 + $0x37] ss:$2 sm:$0xff]  ;;  %v1510_v41 = vld [vmem:[%s1832_s8 + $0x24] ss:$2 sm:$0xff]  ;;  %391 = vst.msk [vmem:[#allocation3 + $0x58] sm:$0xff] %vm195_vm0, %v1536_v60 }
  0x1a   : > { %1600 = vmatprep.subr.mxu0 %v632_v20  ;;  %271 = vst.msk [vmem:[#allocation3 + $0x20] sm:$0xff] %vm195_vm0, %v1514_v39  ;;  %v1524_v42 = vld [vmem:[%s1832_s8 + $0x5c] ss:$2 sm:$0xff]  ;;  %249 = vst.msk [vmem:[#allocation3 + $0x18] sm:$0xff] %vm195_vm0, %v1510_v41  ;;  %v642_v44 = vld [vmem:[%s2351_s1 + $0x110] sm:$0xff]  ;;  %1704 = vmatpush3.msra.mxu1 %v643_v38 }
  0x1b   : > { %1601 = vmatpush3.msra.mxu0 %v616_v21  ;;  %v611_v45 = vld [vmem:[%s2351_s1 + $0x18] sm:$0xff]  ;;  %v626_v46 = vld [vmem:[%s2351_s1 + $0x90] sm:$0xff]  ;;  %1705 = vmatprep.subr.mxu1 %v642_v44  ;;  %v641_v50 = vld [vmem:[%s2351_s1 + $0x108] sm:$0xff] }
  0x1c   : > { %275 = vrot.lane.b32.xlu0 %v1515_v22, %s1767_s13  ;;  %1602 = vmatprep.subr.mxu0 %v631_v24  ;;  %v610_v47 = vld [vmem:[%s2351_s1 + $0x10] sm:$0xff]  ;;  %v1523_v53 = vld [vmem:[%s1832_s8 + $0x5b] ss:$2 sm:$0xff]  ;;  %v1522_v0 = vld [vmem:[%s1832_s8 + $0x5a] ss:$2 sm:$0xff] }
  0x1d   : > { %252 = vrot.lane.b32.xlu1 %v1511_v23, %s1767_s13  ;;  %1603 = vmatpush3.msra.mxu0 %v615_v25  ;;  %v1525_v48 = vld [vmem:[%s1832_s8 + $0x6c] ss:$2 sm:$0xff]  ;;  %319 = vst.msk [vmem:[#allocation3 + $0x38] sm:$0xff] %vm195_vm0, %v1523_v53  ;;  %v1532_v55 = vld [vmem:[%s1832_s8 + $0x7f] ss:$2 sm:$0xff] }
  0x1e   : > { %1604 = vmatprep.subr.mxu0 %v630_v26  ;;  %v1521_v49 = vld [vmem:[%s1832_s8 + $0x4a] ss:$2 sm:$0xff]  ;;  %1706 = vmatpush3.msra.mxu1 %v642_v44  ;;  %v640_v59 = vld [vmem:[%s2351_s1 + $0x100] sm:$0xff]  ;;  %367 = vst.msk [vmem:[#allocation3 + $0x50] sm:$0xff] %vm195_vm0, %v1532_v55  ;;  %v1526_v63 = vld [vmem:[%s1832_s8 + $0x6d] ss:$2 sm:$0xff] }
  0x1f   : > { %1605 = vmatpush3.msra.mxu0 %v614_v29  ;;  %v1509_v51 = vld [vmem:[%s1832_s8 + $0x26] ss:$2 sm:$0xff]  ;;  %1707 = vmatprep.subr.mxu1 %v641_v50  ;;  %v1541_v4 = vld [vmem:[%s1832_s8 + $0xa3] ss:$2 sm:$0xff]  ;;  %v1545_v15 = vld [vmem:[%s1832_s8 + $0xb6] ss:$2 sm:$0xff] }
  0x20   : > { %282 = vrot.lane.b32.xlu0 %v1516_v27, %s1768_s14  ;;  %1606 = vmatprep.subr.mxu0 %v629_v30  ;;  %v1518_v52 = vld [vmem:[%s1832_s8 + $0x4a] ss:$2 sm:$0xff]  ;;  %247 = vst.msk [vmem:[#allocation3 + $0x10] sm:$0xff] %vm195_vm0, %v1509_v51  ;;  %v624_v62 = vld [vmem:[%s2351_s1 + $0x80] sm:$0xff]  ;;  %415 = vst.msk [vmem:[#allocation3 + $0x68] sm:$0xff] %vm195_vm0, %v1541_v4 }
  0x21   : > { %258 = vrot.lane.b32.xlu1 %v1512_v28, %s1768_s14  ;;  %1607 = vmatpush3.msra.mxu0 %v613_v35  ;;  %295 = vst.msk [vmem:[#allocation3 + $0x28] sm:$0xff] %vm195_vm0, %v1518_v52  ;;  %v1519_v54 = vld [vmem:[%s1832_s8 + $0x48] ss:$2 sm:$0xff]  ;;  %v608_v1 = vld [vmem:[%s2351_s1] sm:$0xff]  ;;  %v1529_v6 = vld [vmem:[%s1832_s8 + $0x6d] ss:$2 sm:$0xff] }
  0x22   : > { %1608 = vmatprep.subr.mxu0 %v628_v36  ;;  %297 = vst.msk [vmem:[#allocation3 + $0x30] sm:$0xff] %vm195_vm0, %v1519_v54  ;;  %v1528_v56 = vld [vmem:[%s1832_s8 + $0x6c] ss:$2 sm:$0xff]  ;;  %1708 = vmatpush3.msra.mxu1 %v641_v50  ;;  %v595_v9 = vld [vmem:[#allocation3 + $0x58] sm:$0xff]  ;;  %v1535_v12 = vld [vmem:[%s1832_s8 + $0x91] ss:$2 sm:$0xff] }
  0x23   : > { %1609 = vmatpush3.msra.mxu0 %v612_v37  ;;  %v1527_v57 = vld [vmem:[%s1832_s8 + $0x6e] ss:$2 sm:$0xff]  ;;  %345 = vst.msk [vmem:[#allocation3 + $0x48] sm:$0xff] %vm195_vm0, %v1528_v56  ;;  %1709 = vmatprep.subr.mxu1 %v640_v59  ;;  %v1531_v13 = vld [vmem:[%s1832_s8 + $0x7e] ss:$2 sm:$0xff]  ;;  %439 = vst.msk [vmem:[#allocation3 + $0x70] sm:$0xff] %vm195_vm0, %v1545_v15 }
  0x24   : > { %289 = vrot.lane.b32.xlu0 %v1517_v31, %s1769_s29  ;;  %1610 = vmatprep.subr.mxu0 %v627_v40  ;;  %v625_v58 = vld [vmem:[%s2351_s1 + $0x88] sm:$0xff]  ;;  %343 = vst.msk [vmem:[#allocation3 + $0x40] sm:$0xff] %vm195_vm0, %v1527_v57  ;;  %v1537_v8 = vld [vmem:[%s1832_s8 + $0x90] ss:$2 sm:$0xff]  ;;  %v1538_v17 = vld [vmem:[%s1832_s8 + $0x91] ss:$2 sm:$0xff] }
  0x25   : > { %265 = vrot.lane.b32.xlu1 %v1513_v33, %s1769_s29  ;;  %1611 = vmatpush3.msra.mxu0 %v611_v45  ;;  %v609_v61 = vld [vmem:[%s2351_s1 + $0x8] sm:$0xff]  ;;  %393 = vst.msk [vmem:[#allocation3 + $0x60] sm:$0xff] %vm195_vm0, %v1537_v8  ;;  %v1534_v10 = vld [vmem:[%s1832_s8 + $0x90] ss:$2 sm:$0xff]  ;;  %v1544_v23 = vld [vmem:[%s1832_s8 + $0xb5] ss:$2 sm:$0xff] }
  0x26   : > { %1612 = vmatprep.subr.mxu0 %v626_v46  ;;  %1710 = vmatpush3.msra.mxu1 %v640_v59  ;;  %v1533_v5 = vld [vmem:[%s1832_s8 + $0x80] ss:$2 sm:$0xff]  ;;  %v1550_v14 = vld [vmem:[%s1832_s8 + $0xc7] ss:$2 sm:$0xff]  ;;  %v1569_v46 = vld [vmem:[%s1832_s8 + $0x110] ss:$2 sm:$0xff] }
  0x27   : > { %1613 = vmatpush3.msra.mxu0 %v610_v47  ;;  %v586_v2 = vld [vmem:[#allocation3 + $0x10] sm:$0xff]  ;;  %463 = vst.msk [vmem:[#allocation3 + $0x80] sm:$0xff] %vm195_vm0, %v1550_v14  ;;  %v1542_v16 = vld [vmem:[%s1832_s8 + $0xa4] ss:$2 sm:$0xff]  ;;  %v1571_v50 = vld [vmem:[%s1832_s8 + $0x121] ss:$2 sm:$0xff] }
  0x28   : > { %323 = vrot.lane.b32.xlu0 %v1524_v42, %s1767_s13  ;;  %1614 = vmatprep.subr.mxu0 %v625_v58  ;;  %v589_v3 = vld [vmem:[#allocation3 + $0x28] sm:$0xff]  ;;  %v1554_v18 = vld [vmem:[%s1832_s8 + $0xda] ss:$2 sm:$0xff]  ;;  %v1553_v32 = vld [vmem:[%s1832_s8 + $0xd9] ss:$2 sm:$0xff] }
  0x29   : > { %300 = vrot.lane.b32.xlu1 %v1520_v43, %s1767_s13  ;;  %1615 = vmatpush3.msra.mxu0 %v609_v61  ;;  %v1530_v11 = vld [vmem:[%s1832_s8 + $0x6e] ss:$2 sm:$0xff]  ;;  %487 = vst.msk [vmem:[#allocation3 + $0x88] sm:$0xff] %vm195_vm0, %v1554_v18  ;;  %v1559_v26 = vld [vmem:[%s1832_s8 + $0xeb] ss:$2 sm:$0xff] }
  0x2a   : > { %1616 = vmatprep.subr.mxu0 %v624_v62  ;;  %1711 = vmatprep.mubr.msk.f32.mxu1 %vm195_vm0, %v586_v2  ;;  %v1546_v19 = vld [vmem:[%s1832_s8 + $0xb4] ss:$2 sm:$0xff]  ;;  %511 = vst.msk [vmem:[#allocation3 + $0x98] sm:$0xff] %vm195_vm0, %v1559_v26  ;;  %v1547_v28 = vld [vmem:[%s1832_s8 + $0xb5] ss:$2 sm:$0xff] }
  0x2b   : > { %1617 = vmatpush3.msra.mxu0 %v608_v1  ;;  %v592_v7 = vld [vmem:[#allocation3 + $0x40] sm:$0xff]  ;;  %1712 = vmatmul.mubr.msk.f32.vlgmr.msra.gmra.mxu1 %vm195_vm0, %v589_v3  ;;  %441 = vst.msk [vmem:[#allocation3 + $0x78] sm:$0xff] %vm195_vm0, %v1546_v19  ;;  %v1543_v20 = vld [vmem:[%s1832_s8 + $0xb4] ss:$2 sm:$0xff]  ;;  %v1556_v37 = vld [vmem:[%s1832_s8 + $0xd9] ss:$2 sm:$0xff] }
  0x2c   : > { %330 = vrot.lane.b32.xlu0 %v1525_v48, %s1768_s14  ;;  %1714 = vmatprep.mubr.msk.f32.mxu1 %vm195_vm0, %v592_v7  ;;  %v1539_v21 = vld [vmem:[%s1832_s8 + $0x92] ss:$2 sm:$0xff]  ;;  %v1540_v24 = vld [vmem:[%s1832_s8 + $0xa2] ss:$2 sm:$0xff]  ;;  %v1568_v34 = vld [vmem:[%s1832_s8 + $0x10f] ss:$2 sm:$0xff] }
  0x2d   : > { %306 = vrot.lane.b32.xlu1 %v1521_v49, %s1768_s14  ;;  %v598_v22 = vld [vmem:[#allocation3 + $0x70] sm:$0xff]  ;;  %v1551_v27 = vld [vmem:[%s1832_s8 + $0xc8] ss:$2 sm:$0xff]  ;;  %559 = vst.msk [vmem:[#allocation3 + $0xb0] sm:$0xff] %vm195_vm0, %v1568_v34 }
  0x2e   : > { %v1555_v29 = vld [vmem:[%s1832_s8 + $0xd8] ss:$2 sm:$0xff]  ;;  %v1562_v43 = vld [vmem:[%s1832_s8 + $0xfd] ss:$2 sm:$0xff] }
  0x2f   : > { %1715 = vmatmul.mubr.msk.f32.gmra.mxu1 %vm195_vm0, %v595_v9  ;;  %489 = vst.msk [vmem:[#allocation3 + $0x90] sm:$0xff] %vm195_vm0, %v1555_v29  ;;  %v1552_v30 = vld [vmem:[%s1832_s8 + $0xd8] ss:$2 sm:$0xff]  ;;  %v1565_v47 = vld [vmem:[%s1832_s8 + $0xfd] ss:$2 sm:$0xff] }
  0x30   : > { %337 = vrot.lane.b32.xlu0 %v1526_v63, %s1769_s29  ;;  %1717 = vmatprep.mubr.msk.f32.mxu1 %vm195_vm0, %v598_v22  ;;  %v601_v25 = vld [vmem:[#allocation3 + $0x88] sm:$0xff]  ;;  %v1563_v35 = vld [vmem:[%s1832_s8 + $0xfe] ss:$2 sm:$0xff] }
  0x31   : > { %313 = vrot.lane.b32.xlu1 %v1522_v0, %s1769_s29  ;;  %v1548_v31 = vld [vmem:[%s1832_s8 + $0xb6] ss:$2 sm:$0xff]  ;;  %v1549_v33 = vld [vmem:[%s1832_s8 + $0xc6] ss:$2 sm:$0xff]  ;;  %535 = vst.msk [vmem:[#allocation3 + $0xa0] sm:$0xff] %vm195_vm0, %v1563_v35 }
  0x32   : > { %v1560_v36 = vld [vmem:[%s1832_s8 + $0xec] ss:$2 sm:$0xff]  ;;  %v1564_v39 = vld [vmem:[%s1832_s8 + $0xfc] ss:$2 sm:$0xff] }
  0x33   : > { %1718 = vmatmul.mubr.msk.f32.gmra.mxu1 %vm195_vm0, %v601_v25  ;;  %v1572_v38 = vld [vmem:[%s1832_s8 + $0x122] ss:$2 sm:$0xff]  ;;  %537 = vst.msk [vmem:[#allocation3 + $0xa8] sm:$0xff] %vm195_vm0, %v1564_v39 }
  0x34   : > { %371 = vrot.lane.b32.xlu0 %v1533_v5, %s1767_s13  ;;  %583 = vst.msk [vmem:[#allocation3 + $0xb8] sm:$0xff] %vm195_vm0, %v1572_v38  ;;  %v1561_v40 = vld [vmem:[%s1832_s8 + $0xfc] ss:$2 sm:$0xff] }
  0x35   : > { %348 = vrot.lane.b32.xlu1 %v1529_v6, %s1767_s13  ;;  %v1557_v41 = vld [vmem:[%s1832_s8 + $0xda] ss:$2 sm:$0xff]  ;;  %v1558_v44 = vld [vmem:[%s1832_s8 + $0xea] ss:$2 sm:$0xff] }
  0x36   : > { %v1570_v48 = vld [vmem:[%s1832_s8 + $0x120] ss:$2 sm:$0xff] }
  0x37   : > { %v1566_v49 = vld [vmem:[%s1832_s8 + $0xfe] ss:$2 sm:$0xff]  ;;  %v1567_v51 = vld [vmem:[%s1832_s8 + $0x10e] ss:$2 sm:$0xff] }
  0x38   : > { %378 = vrot.lane.b32.xlu0 %v1534_v10, %s1768_s14  ;;  %v604_v42 = vld [vmem:[#allocation3 + $0xa0] sm:$0xff] }
  0x39   : > { %354 = vrot.lane.b32.xlu1 %v1530_v11, %s1768_s14  ;;  %1720 = vmatprep.mubr.msk.f32.mxu1 %vm195_vm0, %v604_v42 }
  0x3b   : > { %v607_v45 = vld [vmem:[#allocation3 + $0xb8] sm:$0xff] }
  0x3c   : > { %385 = vrot.lane.b32.xlu0 %v1535_v12, %s1769_s29  ;;  %1721 = vmatmul.mubr.msk.f32.gmra.mxu1 %vm195_vm0, %v607_v45 }
  0x3d   : > { %361 = vrot.lane.b32.xlu1 %v1531_v13, %s1769_s29 }
  0x40   : > { %419 = vrot.lane.b32.xlu0 %v1542_v16, %s1767_s13 }
  0x41   : > { %396 = vrot.lane.b32.xlu1 %v1538_v17, %s1767_s13 }
  0x44   : > { %426 = vrot.lane.b32.xlu0 %v1543_v20, %s1768_s14 }
  0x45   : > { %402 = vrot.lane.b32.xlu1 %v1539_v21, %s1768_s14 }
  0x48   : > { %433 = vrot.lane.b32.xlu0 %v1544_v23, %s1769_s29 }
  0x49   : > { %409 = vrot.lane.b32.xlu1 %v1540_v24, %s1769_s29 }
  0x4c   : > { %467 = vrot.lane.b32.xlu0 %v1551_v27, %s1767_s13 }
  0x4d   : > { %444 = vrot.lane.b32.xlu1 %v1547_v28, %s1767_s13 }
  0x50   : > { %474 = vrot.lane.b32.xlu0 %v1552_v30, %s1768_s14 }
  0x51   : > { %450 = vrot.lane.b32.xlu1 %v1548_v31, %s1768_s14 }
  0x54   : > { %481 = vrot.lane.b32.xlu0 %v1553_v32, %s1769_s29 }
  0x55   : > { %457 = vrot.lane.b32.xlu1 %v1549_v33, %s1769_s29 }
  0x58   : > { %515 = vrot.lane.b32.xlu0 %v1560_v36, %s1767_s13 }
  0x59   : > { %492 = vrot.lane.b32.xlu1 %v1556_v37, %s1767_s13 }
  0x5c   : > { %522 = vrot.lane.b32.xlu0 %v1561_v40, %s1768_s14 }
  0x5d   : > { %498 = vrot.lane.b32.xlu1 %v1557_v41, %s1768_s14 }
  0x60   : > { %529 = vrot.lane.b32.xlu0 %v1562_v43, %s1769_s29 }
  0x61   : > { %505 = vrot.lane.b32.xlu1 %v1558_v44, %s1769_s29  ;;  %v1770_v44 = vmov 0.0  }
  0x62   : > { %903 = vst.msk [vmem:[#allocation2 + $0x8] sm:$0xff] %vm195_vm0, %v1770_v44  ;;  %904 = vst.msk [vmem:[#allocation2 + $0x10] sm:$0xff] %vm195_vm0, %v1770_v44 }
  0x63   : > { %902 = vst.msk [vmem:[#allocation2] sm:$0xff] %vm195_vm0, %v1770_v44  ;;  %905 = vst.msk [vmem:[#allocation2 + $0x18] sm:$0xff] %vm195_vm0, %v1770_v44 }
  0x64   : > { %563 = vrot.lane.b32.xlu0 %v1569_v46, %s1767_s13  ;;  %906 = vst.msk [vmem:[#allocation2 + $0x20] sm:$0xff] %vm195_vm0, %v1770_v44  ;;  %907 = vst.msk [vmem:[#allocation2 + $0x28] sm:$0xff] %vm195_vm0, %v1770_v44 }
  0x65   : > { %540 = vrot.lane.b32.xlu1 %v1565_v47, %s1767_s13  ;;  %908 = vst.msk [vmem:[#allocation2 + $0x30] sm:$0xff] %vm195_vm0, %v1770_v44  ;;  %909 = vst.msk [vmem:[#allocation2 + $0x38] sm:$0xff] %vm195_vm0, %v1770_v44 }
  0x66   : > { %910 = vst.msk [vmem:[#allocation2 + $0x40] sm:$0xff] %vm195_vm0, %v1770_v44  ;;  %911 = vst.msk [vmem:[#allocation2 + $0x48] sm:$0xff] %vm195_vm0, %v1770_v44 }
  0x67   : > { %912 = vst.msk [vmem:[#allocation2 + $0x50] sm:$0xff] %vm195_vm0, %v1770_v44  ;;  %913 = vst.msk [vmem:[#allocation2 + $0x58] sm:$0xff] %vm195_vm0, %v1770_v44 }
  0x68   : > { %570 = vrot.lane.b32.xlu0 %v1570_v48, %s1768_s14 }
  0x69   : > { %546 = vrot.lane.b32.xlu1 %v1566_v49, %s1768_s14 }
  0x6a   : > { %v927_v49 = vld [vmem:[#allocation2 + $0x1] ss:$2 sm:$0xf] }
  0x6c   : > { %577 = vrot.lane.b32.xlu0 %v1571_v50, %s1769_s29 }
  0x6d   : > { %553 = vrot.lane.b32.xlu1 %v1567_v51, %s1769_s29 }
  0x70   : > { %929 = vrot.lane.b32.xlu0 %v927_v49, %s1767_s13 }
  0x82   : > { %v228_v52 = vpop.permute.xlu0 %227 }
  0x83   : > { %v235_v53 = vpop.permute.xlu1 %234  ;;  %230 = vst.msk [vmem:[#allocation3 + $0x8] sm:$0xff] %vm203_vm1, %v228_v52  ;;  %v935_v52 = vld [vmem:[#allocation2 + $0x2] ss:$2 sm:$0xf] }
  0x84   : > { %237 = vst.msk [vmem:[#allocation3 + $0x8] sm:$0xff] %vm211_vm2, %v235_v53  ;;  %937 = vrot.lane.b32.xlu0 %v935_v52, %s1768_s14 }
  0x86   : > { %v201_v54 = vpop.permute.xlu0 %200 }
  0x87   : > { %v209_v55 = vpop.permute.xlu1 %208  ;;  %204 = vst.msk [vmem:[#allocation3] sm:$0xff] %vm203_vm1, %v201_v54 }
  0x88   : > { %212 = vst.msk [vmem:[#allocation3] sm:$0xff] %vm211_vm2, %v209_v55  ;;  %v924_v55 = vld [vmem:[#allocation2] ss:$2 sm:$0xf] }
  0x89   : > { %925 = vst.msk [vmem:[#allocation4] sm:$0xf] %vm914_vm4, %v924_v55 }
  0x8a   : > { %v242_v56 = vpop.permute.xlu0 %241 }
  0x8b   : > { %v217_v57 = vpop.permute.xlu1 %216  ;;  %244 = vst.msk [vmem:[#allocation3 + $0x8] sm:$0xff] %vm219_vm3, %v242_v56 }
  0x8c   : > { %220 = vst.msk [vmem:[#allocation3] sm:$0xff] %vm219_vm3, %v217_v57 }
  0x8e   : > { %v276_v58 = vpop.permute.xlu0 %275 }
  0x8f   : > { %v253_v59 = vpop.permute.xlu1 %252  ;;  %278 = vst.msk [vmem:[#allocation3 + $0x20] sm:$0xff] %vm203_vm1, %v276_v58 }
  0x90   : > { %255 = vst.msk [vmem:[#allocation3 + $0x18] sm:$0xff] %vm203_vm1, %v253_v59 }
  0x92   : > { %v283_v60 = vpop.permute.xlu0 %282  ;;  %v585_v62 = vld [vmem:[#allocation3 + $0x8] sm:$0xff] }
  0x93   : > { %v259_v61 = vpop.permute.xlu1 %258  ;;  %v584_v63 = vld [vmem:[#allocation3] sm:$0xff]  ;;  %285 = vst.msk [vmem:[#allocation3 + $0x20] sm:$0xff] %vm211_vm2, %v283_v60  ;;  %732 = vmatprep.mubr.f32.mxu0 %v585_v62 }
  0x94   : > { %261 = vst.msk [vmem:[#allocation3 + $0x18] sm:$0xff] %vm211_vm2, %v259_v61  ;;  %733 = vmatmul.mubr.f32.vlgmr.msra.gmra.mxu0 %v584_v63 }
  0x96   : > { %v290_v0 = vpop.permute.xlu0 %289 }
  0x97   : > { %v266_v1 = vpop.permute.xlu1 %265  ;;  %292 = vst.msk [vmem:[#allocation3 + $0x20] sm:$0xff] %vm219_vm3, %v290_v0 }
  0x98   : > { %268 = vst.msk [vmem:[#allocation3 + $0x18] sm:$0xff] %vm219_vm3, %v266_v1 }
  0x9a   : > { %v324_v2 = vpop.permute.xlu0 %323 }
  0x9b   : > { %v301_v3 = vpop.permute.xlu1 %300  ;;  %326 = vst.msk [vmem:[#allocation3 + $0x38] sm:$0xff] %vm203_vm1, %v324_v2 }
  0x9c   : > { %303 = vst.msk [vmem:[#allocation3 + $0x30] sm:$0xff] %vm203_vm1, %v301_v3 }
  0x9e   : > { %v331_v4 = vpop.permute.xlu0 %330  ;;  %v588_v6 = vld [vmem:[#allocation3 + $0x20] sm:$0xff] }
  0x9f   : > { %v307_v5 = vpop.permute.xlu1 %306  ;;  %v587_v7 = vld [vmem:[#allocation3 + $0x18] sm:$0xff]  ;;  %333 = vst.msk [vmem:[#allocation3 + $0x38] sm:$0xff] %vm211_vm2, %v331_v4  ;;  %737 = vmatprep.mubr.f32.mxu0 %v588_v6 }
  0xa0   : > { %309 = vst.msk [vmem:[#allocation3 + $0x30] sm:$0xff] %vm211_vm2, %v307_v5  ;;  %738 = vmatmul.mubr.f32.gmra.mxu0 %v587_v7 }
  0xa2   : > { %v338_v8 = vpop.permute.xlu0 %337 }
  0xa3   : > { %v314_v9 = vpop.permute.xlu1 %313  ;;  %340 = vst.msk [vmem:[#allocation3 + $0x38] sm:$0xff] %vm219_vm3, %v338_v8 }
  0xa4   : > { %316 = vst.msk [vmem:[#allocation3 + $0x30] sm:$0xff] %vm219_vm3, %v314_v9 }
  0xa6   : > { %v372_v10 = vpop.permute.xlu0 %371 }
  0xa7   : > { %v349_v11 = vpop.permute.xlu1 %348  ;;  %374 = vst.msk [vmem:[#allocation3 + $0x50] sm:$0xff] %vm203_vm1, %v372_v10 }
  0xa8   : > { %351 = vst.msk [vmem:[#allocation3 + $0x48] sm:$0xff] %vm203_vm1, %v349_v11 }
  0xaa   : > { %v379_v12 = vpop.permute.xlu0 %378  ;;  %v591_v14 = vld [vmem:[#allocation3 + $0x38] sm:$0xff] }
  0xab   : > { %v355_v13 = vpop.permute.xlu1 %354  ;;  %v590_v15 = vld [vmem:[#allocation3 + $0x30] sm:$0xff]  ;;  %381 = vst.msk [vmem:[#allocation3 + $0x50] sm:$0xff] %vm211_vm2, %v379_v12  ;;  %742 = vmatprep.mubr.f32.mxu0 %v591_v14  ;;  %v1191_v14 = vld [vmem:[%s2352_s2 + $0xf0] sm:$0xff] }
  0xac   : > { %357 = vst.msk [vmem:[#allocation3 + $0x48] sm:$0xff] %vm211_vm2, %v355_v13  ;;  %743 = vmatmul.mubr.f32.gmra.mxu0 %v590_v15  ;;  %v1192_v12 = vld [vmem:[%s2352_s2 + $0xf8] sm:$0xff] }
  0xad   : > { %v1176_v13 = vld [vmem:[%s2352_s2 + $0x78] sm:$0xff]  ;;  %1654 = vmatprep.subr.mxu1 %v1192_v12 }
  0xae   : > { %v386_v16 = vpop.permute.xlu0 %385  ;;  %1655 = vmatpush3.msra.mxu1 %v1176_v13 }
  0xaf   : > { %v362_v17 = vpop.permute.xlu1 %361  ;;  %388 = vst.msk [vmem:[#allocation3 + $0x50] sm:$0xff] %vm219_vm3, %v386_v16  ;;  %v1175_v16 = vld [vmem:[%s2352_s2 + $0x70] sm:$0xff]  ;;  %1656 = vmatprep.subr.mxu1 %v1191_v14 }
  0xb0   : > { %364 = vst.msk [vmem:[#allocation3 + $0x48] sm:$0xff] %vm219_vm3, %v362_v17  ;;  %v1190_v17 = vld [vmem:[%s2352_s2 + $0xe8] sm:$0xff]  ;;  %1657 = vmatpush3.msra.mxu1 %v1175_v16  ;;  %v1177_v16 = vld [vmem:[%s2352_s2 + $0x80] sm:$0xff] }
  0xb1   : > { %1658 = vmatprep.subr.mxu1 %v1190_v17 }
  0xb2   : > { %v420_v18 = vpop.permute.xlu0 %419 }
  0xb3   : > { %v397_v19 = vpop.permute.xlu1 %396  ;;  %422 = vst.msk [vmem:[#allocation3 + $0x68] sm:$0xff] %vm203_vm1, %v420_v18 }
  0xb4   : > { %399 = vst.msk [vmem:[#allocation3 + $0x60] sm:$0xff] %vm203_vm1, %v397_v19 }
  0xb6   : > { %v427_v20 = vpop.permute.xlu0 %426  ;;  %v594_v22 = vld [vmem:[#allocation3 + $0x50] sm:$0xff] }
  0xb7   : > { %v403_v21 = vpop.permute.xlu1 %402  ;;  %v593_v23 = vld [vmem:[#allocation3 + $0x48] sm:$0xff]  ;;  %429 = vst.msk [vmem:[#allocation3 + $0x68] sm:$0xff] %vm211_vm2, %v427_v20  ;;  %747 = vmatprep.mubr.f32.mxu0 %v594_v22  ;;  %v1174_v20 = vld [vmem:[%s2352_s2 + $0x68] sm:$0xff]  ;;  %v1189_v22 = vld [vmem:[%s2352_s2 + $0xe0] sm:$0xff] }
  0xb8   : > { %405 = vst.msk [vmem:[#allocation3 + $0x60] sm:$0xff] %vm211_vm2, %v403_v21  ;;  %748 = vmatmul.mubr.f32.gmra.mxu0 %v593_v23  ;;  %1659 = vmatpush3.msra.mxu1 %v1174_v20 }
  0xb9   : > { %1660 = vmatprep.subr.mxu1 %v1189_v22 }
  0xba   : > { %v434_v24 = vpop.permute.xlu0 %433 }
  0xbb   : > { %v410_v25 = vpop.permute.xlu1 %409  ;;  %436 = vst.msk [vmem:[#allocation3 + $0x68] sm:$0xff] %vm219_vm3, %v434_v24 }
  0xbc   : > { %412 = vst.msk [vmem:[#allocation3 + $0x60] sm:$0xff] %vm219_vm3, %v410_v25 }
  0xbe   : > { %v468_v26 = vpop.permute.xlu0 %467 }
  0xbf   : > { %v445_v27 = vpop.permute.xlu1 %444  ;;  %470 = vst.msk [vmem:[#allocation3 + $0x80] sm:$0xff] %vm203_vm1, %v468_v26 }
  0xc0   : > { %447 = vst.msk [vmem:[#allocation3 + $0x78] sm:$0xff] %vm203_vm1, %v445_v27 }
  0xc2   : > { %v475_v28 = vpop.permute.xlu0 %474  ;;  %v597_v30 = vld [vmem:[#allocation3 + $0x68] sm:$0xff] }
  0xc3   : > { %v451_v29 = vpop.permute.xlu1 %450  ;;  %v596_v31 = vld [vmem:[#allocation3 + $0x60] sm:$0xff]  ;;  %477 = vst.msk [vmem:[#allocation3 + $0x80] sm:$0xff] %vm211_vm2, %v475_v28  ;;  %752 = vmatprep.mubr.f32.mxu0 %v597_v30 }
  0xc4   : > { %453 = vst.msk [vmem:[#allocation3 + $0x78] sm:$0xff] %vm211_vm2, %v451_v29  ;;  %753 = vmatmul.mubr.f32.gmra.mxu0 %v596_v31  ;;  %v1173_v31 = vld [vmem:[%s2352_s2 + $0x60] sm:$0xff] }
  0xc5   : > { %1661 = vmatpush3.msra.mxu1 %v1173_v31 }
  0xc6   : > { %v482_v32 = vpop.permute.xlu0 %481 }
  0xc7   : > { %v458_v33 = vpop.permute.xlu1 %457  ;;  %484 = vst.msk [vmem:[#allocation3 + $0x80] sm:$0xff] %vm219_vm3, %v482_v32  ;;  %v1188_v32 = vld [vmem:[%s2352_s2 + $0xd8] sm:$0xff] }
  0xc8   : > { %460 = vst.msk [vmem:[#allocation3 + $0x78] sm:$0xff] %vm219_vm3, %v458_v33  ;;  %1662 = vmatprep.subr.mxu1 %v1188_v32 }
  0xca   : > { %v516_v34 = vpop.permute.xlu0 %515 }
  0xcb   : > { %v493_v35 = vpop.permute.xlu1 %492  ;;  %518 = vst.msk [vmem:[#allocation3 + $0x98] sm:$0xff] %vm203_vm1, %v516_v34 }
  0xcc   : > { %495 = vst.msk [vmem:[#allocation3 + $0x90] sm:$0xff] %vm203_vm1, %v493_v35  ;;  %v1172_v35 = vld [vmem:[%s2352_s2 + $0x58] sm:$0xff] }
  0xcd   : > { %1663 = vmatpush3.msra.mxu1 %v1172_v35 }
  0xce   : > { %v523_v36 = vpop.permute.xlu0 %522  ;;  %v600_v38 = vld [vmem:[#allocation3 + $0x80] sm:$0xff] }
  0xcf   : > { %v499_v37 = vpop.permute.xlu1 %498  ;;  %v599_v39 = vld [vmem:[#allocation3 + $0x78] sm:$0xff]  ;;  %525 = vst.msk [vmem:[#allocation3 + $0x98] sm:$0xff] %vm211_vm2, %v523_v36  ;;  %757 = vmatprep.mubr.f32.mxu0 %v600_v38  ;;  %v1187_v36 = vld [vmem:[%s2352_s2 + $0xd0] sm:$0xff] }
  0xd0   : > { %501 = vst.msk [vmem:[#allocation3 + $0x90] sm:$0xff] %vm211_vm2, %v499_v37  ;;  %758 = vmatmul.mubr.f32.gmra.mxu0 %v599_v39  ;;  %v1171_v39 = vld [vmem:[%s2352_s2 + $0x50] sm:$0xff]  ;;  %1664 = vmatprep.subr.mxu1 %v1187_v36 }
  0xd1   : > { %1665 = vmatpush3.msra.mxu1 %v1171_v39 }
  0xd2   : > { %v530_v40 = vpop.permute.xlu0 %529 }
  0xd3   : > { %v506_v41 = vpop.permute.xlu1 %505  ;;  %532 = vst.msk [vmem:[#allocation3 + $0x98] sm:$0xff] %vm219_vm3, %v530_v40  ;;  %v1186_v40 = vld [vmem:[%s2352_s2 + $0xc8] sm:$0xff] }
  0xd4   : > { %508 = vst.msk [vmem:[#allocation3 + $0x90] sm:$0xff] %vm219_vm3, %v506_v41  ;;  %1666 = vmatprep.subr.mxu1 %v1186_v40 }
  0xd6   : > { %v564_v42 = vpop.permute.xlu0 %563 }
  0xd7   : > { %v541_v43 = vpop.permute.xlu1 %540  ;;  %566 = vst.msk [vmem:[#allocation3 + $0xb0] sm:$0xff] %vm203_vm1, %v564_v42  ;;  %v1170_v42 = vld [vmem:[%s2352_s2 + $0x48] sm:$0xff] }
  0xd8   : > { %543 = vst.msk [vmem:[#allocation3 + $0xa8] sm:$0xff] %vm203_vm1, %v541_v43  ;;  %v1185_v43 = vld [vmem:[%s2352_s2 + $0xc0] sm:$0xff]  ;;  %1667 = vmatpush3.msra.mxu1 %v1170_v42  ;;  %vm948_vm1 = vcmask 1044224  }
  0xd9   : > { %1668 = vmatprep.subr.mxu1 %v1185_v43 }
  0xda   : > { %v571_v45 = vpop.permute.xlu0 %570  ;;  %v603_v47 = vld [vmem:[#allocation3 + $0x98] sm:$0xff] }
  0xdb   : > { %v547_v46 = vpop.permute.xlu1 %546  ;;  %v602_v48 = vld [vmem:[#allocation3 + $0x90] sm:$0xff]  ;;  %573 = vst.msk [vmem:[#allocation3 + $0xb0] sm:$0xff] %vm211_vm2, %v571_v45  ;;  %762 = vmatprep.mubr.f32.mxu0 %v603_v47 }
  0xdc   : > { %549 = vst.msk [vmem:[#allocation3 + $0xa8] sm:$0xff] %vm211_vm2, %v547_v46  ;;  %763 = vmatmul.mubr.f32.gmra.mxu0 %v602_v48  ;;  %v1169_v46 = vld [vmem:[%s2352_s2 + $0x40] sm:$0xff]  ;;  %v1184_v48 = vld [vmem:[%s2352_s2 + $0xb8] sm:$0xff]  ;;  %vm989_vm2 = vcmask 523524  }
  0xdd   : > { %1669 = vmatpush3.msra.mxu1 %v1169_v46 }
  0xde   : > { %v578_v50 = vpop.permute.xlu0 %577  ;;  %1670 = vmatprep.subr.mxu1 %v1184_v48 }
  0xdf   : > { %v554_v51 = vpop.permute.xlu1 %553  ;;  %580 = vst.msk [vmem:[#allocation3 + $0xb0] sm:$0xff] %vm219_vm3, %v578_v50 }
  0xe0   : > { %556 = vst.msk [vmem:[#allocation3 + $0xa8] sm:$0xff] %vm219_vm3, %v554_v51  ;;  %vm997_vm3 = vcmask 785924  }
  0xe2   : > { %v930_v56 = vpop.permute.xlu0 %929 }
  0xe3   : > { %933 = vst.msk [vmem:[#allocation4] sm:$0xf] %vm932_vm5, %v930_v56 }
  0xe6   : > { %v606_v53 = vld [vmem:[#allocation3 + $0xb0] sm:$0xff] }
  0xe7   : > { %v605_v54 = vld [vmem:[#allocation3 + $0xa8] sm:$0xff]  ;;  %767 = vmatprep.mubr.f32.mxu0 %v606_v53 }
  0xe8   : > { %768 = vmatmul.mubr.f32.gmra.mxu0 %v605_v54  ;;  %v1168_v54 = vld [vmem:[%s2352_s2 + $0x38] sm:$0xff] }
  0xe9   : > { %1671 = vmatpush3.msra.mxu1 %v1168_v54 }
  0xeb   : > { %v1713_v57 = vpop.f32.mrf.mxu1 }
  0xed   : > { %v839_v61 = vpop.f32.mrf.mxu1 }
  0xef   : > { %v1716_v11 = vpop.f32.mrf.mxu1 }
  0xf1   : > { %v849_v19 = vpop.f32.mrf.mxu1 }
  0xf6   : > { %v938_v59 = vpop.permute.xlu0 %937 }
  0xf7   : > { %941 = vst.msk [vmem:[#allocation4] sm:$0xf] %vm940_vm6, %v938_v59  ;;  %v1182_v59 = vld [vmem:[%s2352_s2 + $0xa8] sm:$0xff] }
 0x154   : > { %v1618_v58 = vpop.f32.mrf.mxu0 }
 0x156   : > { %v1619_v60 = vpop.f32.mrf.mxu0 }
 0x157   : > { %v1620_v62 = vadd.f32 %v1619_v60, %v1618_v58  ;;  %v1167_v58 = vld [vmem:[%s2352_s2 + $0x30] sm:$0xff] }
 0x159   : > { %v840_v63 = vadd.f32 %v1620_v62, %v839_v61  ;;  %v1166_v61 = vld [vmem:[%s2352_s2 + $0x28] sm:$0xff]  ;;  %v1181_v62 = vld [vmem:[%s2352_s2 + $0xa0] sm:$0xff] }
 0x15b   : > { %vm878_vm7 = vcmp.ge.f32.partialorder %v840_v63, 0.0  ;;  %v886_v0 = vmul.f32 0.2, %v840_v63 }
 0x15d   : > { %v894_v1 = vsel %vm878_vm7, %v840_v63, %v886_v0  ;;  %v1719_v0 = vpop.f32.mrf.mxu1 }
 0x15e   : > { %916 = vst.msk [vmem:[#allocation2 + $0xb] sm:$0xff] %vm195_vm0, %v894_v1  ;;  %v1165_v1 = vld [vmem:[%s2352_s2 + $0x20] sm:$0xff] }
 0x160   : > { %v1621_v2 = vpop.f32.mrf.mxu0 }
 0x162   : > { %v1622_v3 = vpop.f32.mrf.mxu0 }
 0x163   : > { %v1623_v4 = vadd.f32 %v1622_v3, %v1621_v2  ;;  %v1180_v2 = vld [vmem:[%s2352_s2 + $0x98] sm:$0xff] }
 0x165   : > { %v845_v5 = vadd.f32 %v1713_v57, %v1623_v4  ;;  %v954_v6 = vld [vmem:[#allocation2 + $0xc] ss:$2 sm:$0xf]  ;;  %v951_v7 = vld [vmem:[#allocation2 + $0xb] ss:$2 sm:$0xf] }
 0x166   : > { %956 = vrot.lane.b32.xlu0 %v954_v6, %s1767_s13  ;;  %952 = vst.msk [vmem:[#allocation4 + $0x8] sm:$0xf] %vm914_vm4, %v951_v7  ;;  %v943_v10 = vld [vmem:[#allocation2 + $0xa] ss:$2 sm:$0xf]  ;;  %v1164_v4 = vld [vmem:[%s2352_s2 + $0x18] sm:$0xff]  ;;  %v859_v7 = vpop.f32.mrf.mxu1 }
 0x167   : > { %vm879_vm8 = vcmp.ge.f32.partialorder %v845_v5, 0.0  ;;  %v887_v8 = vmul.f32 0.2, %v845_v5  ;;  %v1183_v57 = vld [vmem:[%s2352_s2 + $0xb0] sm:$0xff] }
 0x168   : > { %1672 = vmatprep.subr.mxu1 %v1183_v57 }
 0x169   : > { %v895_v9 = vsel %vm879_vm8, %v845_v5, %v887_v8  ;;  %1673 = vmatpush3.msra.mxu1 %v1167_v58  ;;  %v1179_v5 = vld [vmem:[%s2352_s2 + $0x90] sm:$0xff]  ;;  %vm1447_vm8 = vcmask 40960  }
 0x16a   : > { %917 = vst.msk [vmem:[#allocation2 + $0x15] sm:$0xff] %vm195_vm0, %v895_v9  ;;  %945 = vrot.lane.b32.xlu0 %v943_v10, %s1769_s29  ;;  %1674 = vmatprep.subr.mxu1 %v1182_v59  ;;  %v1163_v8 = vld [vmem:[%s2352_s2 + $0x10] sm:$0xff]  ;;  %v1178_v10 = vld [vmem:[%s2352_s2 + $0x88] sm:$0xff] }
 0x16b   : > { %1675 = vmatpush3.msra.mxu1 %v1166_v61 }
 0x16c   : > { %v1624_v15 = vpop.f32.mrf.mxu0  ;;  %1676 = vmatprep.subr.mxu1 %v1181_v62 }
 0x16d   : > { %1677 = vmatpush3.msra.mxu1 %v1165_v1 }
 0x16e   : > { %v1625_v18 = vpop.f32.mrf.mxu0  ;;  %1678 = vmatprep.subr.mxu1 %v1180_v2 }
 0x16f   : > { %v1626_v21 = vadd.f32 %v1625_v18, %v1624_v15  ;;  %1679 = vmatpush3.msra.mxu1 %v1164_v4  ;;  %v1162_v15 = vld [vmem:[%s2352_s2 + $0x8] sm:$0xff] }
 0x170   : > { %1680 = vmatprep.subr.mxu1 %v1179_v5 }
 0x171   : > { %v850_v23 = vadd.f32 %v1626_v21, %v849_v19  ;;  %v961_v24 = vld [vmem:[#allocation2 + $0x14] ss:$2 sm:$0xf]  ;;  %v983_v25 = vld [vmem:[#allocation2 + $0x15] ss:$2 sm:$0xf]  ;;  %1681 = vmatpush3.msra.mxu1 %v1163_v8 }
 0x172   : > { %963 = vrot.lane.b32.xlu1 %v961_v24, %s1768_s14  ;;  %v985_v26 = vrot.slane %v983_v25, 4  ;;  %v968_v28 = vld [vmem:[#allocation2 + $0x15] ss:$2 sm:$0xf]  ;;  %1682 = vmatprep.subr.mxu1 %v1178_v10  ;;  %v1161_v21 = vld [vmem:[%s2352_s2] sm:$0xff] }
 0x173   : > { %vm880_vm9 = vcmp.ge.f32.partialorder %v850_v23, 0.0  ;;  %v888_v27 = vmul.f32 0.2, %v850_v23  ;;  %v991_v29 = vld [vmem:[#allocation2 + $0x16] ss:$2 sm:$0xf]  ;;  %1683 = vmatpush3.msra.mxu1 %v1162_v15 }
 0x174   : > { %986 = vrot.lane.b32.xlu0 %v985_v26, %s1767_s13  ;;  %v975_v30 = vld [vmem:[#allocation2 + $0x16] ss:$2 sm:$0xf]  ;;  %v993_v37 = vrot.slane %v991_v29, 4  ;;  %1684 = vmatprep.subr.mxu1 %v1177_v16 }
 0x175   : > { %v896_v33 = vsel %vm880_vm9, %v850_v23, %v888_v27  ;;  %976 = vst.msk [vmem:[#allocation4 + $0x10] sm:$0xf] %vm914_vm4, %v975_v30  ;;  %v977_v34 = vld [vmem:[#allocation2 + $0x14] ss:$2 sm:$0xf]  ;;  %1685 = vmatpush3.msra.mxu1 %v1161_v21 }
 0x176   : > { %918 = vst.msk [vmem:[#allocation2 + $0x1f] sm:$0xff] %vm195_vm0, %v896_v33  ;;  %970 = vrot.lane.b32.xlu1 %v968_v28, %s1769_s29  ;;  %v979_v38 = vrot.slane %v977_v34, 4  ;;  %v1722_v34 = vpop.f32.mrf.mxu1 }
 0x178   : > { %v1627_v41 = vpop.f32.mrf.mxu0  ;;  %994 = vrot.lane.b32.xlu0 %v993_v37, %s1768_s14  ;;  %982 = vst.msk [vmem:[#allocation4] sm:$0xf0] %vm981_vm10, %v979_v38  ;;  %v869_v37 = vpop.f32.mrf.mxu1 }
 0x17a   : > { %v1628_v45 = vpop.f32.mrf.mxu0 }
 0x17b   : > { %v1629_v47 = vadd.f32 %v1628_v45, %v1627_v41 }
 0x17d   : > { %v855_v49 = vadd.f32 %v1716_v11, %v1629_v47  ;;  %v1015_v50 = vld [vmem:[#allocation2 + $0x20] ss:$2 sm:$0xf]  ;;  %v1009_v53 = vld [vmem:[#allocation2 + $0x1f] ss:$2 sm:$0xf] }
 0x17e   : > { %v1000_v51 = vld [vmem:[#allocation2 + $0x1e] ss:$2 sm:$0xf]  ;;  %v1017_v52 = vrot.slane %v1015_v50, 4  ;;  %v1011_v56 = vrot.slane %v1009_v53, 4 }
 0x17f   : > { %vm881_vm11 = vcmp.ge.f32.partialorder %v855_v49, 0.0  ;;  %v889_v55 = vmul.f32 0.2, %v855_v49  ;;  %v1002_v63 = vrot.slane %v1000_v51, 4 }
 0x180   : > { %1018 = vrot.lane.b32.xlu1 %v1017_v52, %s1767_s13  ;;  %1013 = vst.msk [vmem:[#allocation4 + $0x8] sm:$0xf0] %vm981_vm10, %v1011_v56 }
 0x181   : > { %v897_v60 = vsel %vm881_vm11, %v855_v49, %v889_v55 }
 0x182   : > { %919 = vst.msk [vmem:[#allocation2 + $0x29] sm:$0xff] %vm195_vm0, %v897_v60 }
 0x184   : > { %v1630_v3 = vpop.f32.mrf.mxu0  ;;  %1003 = vrot.lane.b32.xlu1 %v1002_v63, %s1769_s29  ;;  %v1196_v63 = vld [vmem:[%s2352_s2 + $0x118] sm:$0xff] }
 0x185   : > { %1723 = vmatprep.subr.mxu1 %v1196_v63 }
 0x186   : > { %v1631_v6 = vpop.f32.mrf.mxu0 }
 0x187   : > { %v1632_v9 = vadd.f32 %v1631_v6, %v1630_v3 }
 0x189   : > { %v860_v11 = vadd.f32 %v1632_v9, %v859_v7  ;;  %v1046_v12 = vld [vmem:[#allocation2 + $0x29] ss:$2 sm:$0xf]  ;;  %v1023_v13 = vld [vmem:[#allocation2 + $0x28] ss:$2 sm:$0xf] }
 0x18a   : > { %1048 = vrot.lane.b32.xlu0 %v1046_v12, %s1767_s13  ;;  %v1025_v14 = vrot.slane %v1023_v13, 4  ;;  %v1052_v18 = vld [vmem:[#allocation2 + $0x2a] ss:$2 sm:$0xf] }
 0x18b   : > { %vm882_vm12 = vcmp.ge.f32.partialorder %v860_v11, 0.0  ;;  %v890_v17 = vmul.f32 0.2, %v860_v11  ;;  %v1031_v19 = vld [vmem:[#allocation2 + $0x29] ss:$2 sm:$0xf] }
 0x18c   : > { %1026 = vrot.lane.b32.xlu1 %v1025_v14, %s1768_s14  ;;  %v1039_v20 = vld [vmem:[#allocation2 + $0x2a] ss:$2 sm:$0xf]  ;;  %v1033_v25 = vrot.slane %v1031_v19, 4 }
 0x18d   : > { %v898_v22 = vsel %vm882_vm12, %v860_v11, %v890_v17  ;;  %v1041_v23 = vrot.slane %v1039_v20, 4  ;;  %v1044_v24 = vld [vmem:[#allocation2 + $0x28] ss:$2 sm:$0xf] }
 0x18e   : > { %920 = vst.msk [vmem:[#allocation2 + $0x33] sm:$0xff] %vm195_vm0, %v898_v22  ;;  %1054 = vrot.lane.b32.xlu0 %v1052_v18, %s1768_s14 }
 0x18f   : > { %1045 = vst.msk [vmem:[#allocation4 + $0x18] sm:$0xf] %vm914_vm4, %v1044_v24  ;;  %v1194_v24 = vld [vmem:[%s2352_s2 + $0x108] sm:$0xff] }
 0x190   : > { %1043 = vst.msk [vmem:[#allocation4 + $0x10] sm:$0xf0] %vm981_vm10, %v1041_v23  ;;  %v1633_v26 = vpop.f32.mrf.mxu0  ;;  %1034 = vrot.lane.b32.xlu1 %v1033_v25, %s1769_s29  ;;  %v1195_v23 = vld [vmem:[%s2352_s2 + $0x110] sm:$0xff]  ;;  %v1193_v25 = vld [vmem:[%s2352_s2 + $0x100] sm:$0xff] }
 0x192   : > { %v1634_v27 = vpop.f32.mrf.mxu0 }
 0x193   : > { %v1635_v28 = vadd.f32 %v1634_v27, %v1633_v26 }
 0x195   : > { %v865_v29 = vadd.f32 %v1719_v0, %v1635_v28  ;;  %v1069_v30 = vld [vmem:[#allocation2 + $0x34] ss:$2 sm:$0xf]  ;;  %v1066_v31 = vld [vmem:[#allocation2 + $0x33] ss:$2 sm:$0xf] }
 0x196   : > { %1071 = vrot.lane.b32.xlu0 %v1069_v30, %s1767_s13  ;;  %1067 = vst.msk [vmem:[#allocation4 + $0x20] sm:$0xf] %vm914_vm4, %v1066_v31  ;;  %v1059_v55 = vld [vmem:[#allocation2 + $0x32] ss:$2 sm:$0xf] }
 0x197   : > { %vm883_vm13 = vcmp.ge.f32.partialorder %v865_v29, 0.0  ;;  %v891_v32 = vmul.f32 0.2, %v865_v29 }
 0x199   : > { %v899_v33 = vsel %vm883_vm13, %v865_v29, %v891_v32 }
 0x19a   : > { %921 = vst.msk [vmem:[#allocation2 + $0x3d] sm:$0xff] %vm195_vm0, %v899_v33 }
 0x19c   : > { %v1636_v35 = vpop.f32.mrf.mxu0 }
 0x19e   : > { %v1637_v36 = vpop.f32.mrf.mxu0 }
 0x19f   : > { %v1638_v38 = vadd.f32 %v1637_v36, %v1636_v35 }
 0x1a1   : > { %v870_v39 = vadd.f32 %v1638_v38, %v869_v37  ;;  %v1076_v40 = vld [vmem:[#allocation2 + $0x3c] ss:$2 sm:$0xf]  ;;  %v1097_v41 = vld [vmem:[#allocation2 + $0x3d] ss:$2 sm:$0xf] }
 0x1a2   : > { %1078 = vrot.lane.b32.xlu1 %v1076_v40, %s1768_s14  ;;  %v1099_v42 = vrot.slane %v1097_v41, 4  ;;  %v1104_v45 = vld [vmem:[#allocation2 + $0x3e] ss:$2 sm:$0xf]  ;;  %v1371_v40 = vld [vmem:[%s2353_s3 + $0x10] sm:$0xff]  ;;  %v1370_v41 = vld [vmem:[%s2353_s3 + $0x8] sm:$0xff] }
 0x1a3   : > { %vm884_vm14 = vcmp.ge.f32.partialorder %v870_v39, 0.0  ;;  %v892_v43 = vmul.f32 0.2, %v870_v39  ;;  %v1090_v46 = vld [vmem:[#allocation2 + $0x3e] ss:$2 sm:$0xf] }
 0x1a4   : > { %1100 = vrot.lane.b32.xlu0 %v1099_v42, %s1767_s13  ;;  %v1083_v48 = vld [vmem:[#allocation2 + $0x3d] ss:$2 sm:$0xf]  ;;  %1091 = vst.msk [vmem:[#allocation4 + $0x28] sm:$0xf] %vm914_vm4, %v1090_v46  ;;  %v1106_v50 = vrot.slane %v1104_v45, 4 }
 0x1a5   : > { %v900_v47 = vsel %vm884_vm14, %v870_v39, %v892_v43  ;;  %v1092_v49 = vld [vmem:[#allocation2 + $0x3c] ss:$2 sm:$0xf]  ;;  %vm1006_vm4 = vcmask 1048324  }
 0x1a6   : > { %922 = vst.msk [vmem:[#allocation2 + $0x47] sm:$0xff] %vm195_vm0, %v900_v47  ;;  %1085 = vrot.lane.b32.xlu1 %v1083_v48, %s1769_s29  ;;  %v1094_v51 = vrot.slane %v1092_v49, 4  ;;  %v1157_v37 = vld [vmem:[#allocation4 + $0x10] sm:$0xff]  ;;  %v1369_v42 = vld [vmem:[%s2353_s3] sm:$0xff] }
 0x1a7   : > { %v1372_v39 = vld [vmem:[%s2353_s3 + $0x18] sm:$0xff] }
 0x1a8   : > { %v1639_v52 = vpop.f32.mrf.mxu0  ;;  %1107 = vrot.lane.b32.xlu0 %v1106_v50, %s1768_s14  ;;  %1096 = vst.msk [vmem:[#allocation4 + $0x18] sm:$0xf0] %vm981_vm10, %v1094_v51 }
 0x1aa   : > { %v1640_v53 = vpop.f32.mrf.mxu0 }
 0x1ab   : > { %v1641_v54 = vadd.f32 %v1640_v53, %v1639_v52 }
 0x1ac   : > { %1061 = vrot.lane.b32.xlu0 %v1059_v55, %s1769_s29 }
 0x1ad   : > { %v875_v56 = vadd.f32 %v1722_v34, %v1641_v54  ;;  %v1126_v57 = vld [vmem:[#allocation2 + $0x48] ss:$2 sm:$0xf]  ;;  %v1120_v59 = vld [vmem:[#allocation2 + $0x47] ss:$2 sm:$0xf] }
 0x1ae   : > { %v1128_v58 = vrot.slane %v1126_v57, 4  ;;  %v1122_v61 = vrot.slane %v1120_v59, 4  ;;  %v1112_v6 = vld [vmem:[#allocation2 + $0x46] ss:$2 sm:$0xf] }
 0x1af   : > { %vm885_vm15 = vcmp.ge.f32.partialorder %v875_v56, 0.0  ;;  %v893_v60 = vmul.f32 0.2, %v875_v56  ;;  %v1114_v7 = vrot.slane %v1112_v6, 4 }
 0x1b0   : > { %1129 = vrot.lane.b32.xlu1 %v1128_v58, %s1767_s13  ;;  %1124 = vst.msk [vmem:[#allocation4 + $0x20] sm:$0xf0] %vm981_vm10, %v1122_v61 }
 0x1b1   : > { %v901_v62 = vsel %vm885_vm15, %v875_v56, %v893_v60 }
 0x1b2   : > { %923 = vst.msk [vmem:[#allocation2 + $0x51] sm:$0xff] %vm195_vm0, %v901_v62 }
 0x1b9   : > { %v1134_v0 = vld [vmem:[#allocation2 + $0x50] ss:$2 sm:$0xf]  ;;  %v1142_v3 = vld [vmem:[#allocation2 + $0x51] ss:$2 sm:$0xf] }
 0x1ba   : > { %v1136_v1 = vrot.slane %v1134_v0, 4  ;;  %v1150_v2 = vld [vmem:[#allocation2 + $0x52] ss:$2 sm:$0xf]  ;;  %v1144_v5 = vrot.slane %v1142_v3, 4 }
 0x1bb   : > { %v1152_v4 = vrot.slane %v1150_v2, 4 }
 0x1bc   : > { %1137 = vrot.lane.b32.xlu1 %v1136_v1, %s1768_s14 }
 0x1bd   : > { %1154 = vst.msk [vmem:[#allocation4 + $0x28] sm:$0xf0] %vm981_vm10, %v1152_v4 }
 0x1c0   : > { %1145 = vrot.lane.b32.xlu1 %v1144_v5, %s1769_s29 }
 0x1c4   : > { %1115 = vrot.lane.b32.xlu1 %v1114_v7, %s1769_s29  ;;  %v1160_v38 = vld [vmem:[#allocation4 + $0x28] sm:$0xff] }
 0x1d8   : > { %v957_v8 = vpop.permute.xlu0 %956 }
 0x1d9   : > { %959 = vst.msk [vmem:[#allocation4 + $0x8] sm:$0xf] %vm932_vm5, %v957_v8 }
 0x1dc   : > { %v946_v9 = vpop.permute.xlu0 %945 }
 0x1dd   : > { %949 = vst.msk [vmem:[#allocation4] sm:$0xf] %vm948_vm1, %v946_v9 }
 0x1e4   : > { %v964_v10 = vpop.permute.xlu1 %963 }
 0x1e5   : > { %966 = vst.msk [vmem:[#allocation4 + $0x8] sm:$0xf] %vm940_vm6, %v964_v10 }
 0x1e6   : > { %v987_v11 = vpop.permute.xlu0 %986 }
 0x1e7   : > { %990 = vst.msk [vmem:[#allocation4] sm:$0xf0] %vm989_vm2, %v987_v11 }
 0x1e8   : > { %v971_v12 = vpop.permute.xlu1 %970 }
 0x1e9   : > { %973 = vst.msk [vmem:[#allocation4 + $0x8] sm:$0xf] %vm948_vm1, %v971_v12 }
 0x1ea   : > { %v995_v13 = vpop.permute.xlu0 %994 }
 0x1eb   : > { %998 = vst.msk [vmem:[#allocation4] sm:$0xf0] %vm997_vm3, %v995_v13 }
 0x1f2   : > { %v1019_v14 = vpop.permute.xlu1 %1018 }
 0x1f3   : > { %1021 = vst.msk [vmem:[#allocation4 + $0x8] sm:$0xf0] %vm989_vm2, %v1019_v14 }
 0x1f6   : > { %v1004_v15 = vpop.permute.xlu1 %1003 }
 0x1f7   : > { %1007 = vst.msk [vmem:[#allocation4] sm:$0xf0] %vm1006_vm4, %v1004_v15 }
 0x1fc   : > { %v1049_v16 = vpop.permute.xlu0 %1048 }
 0x1fd   : > { %1051 = vst.msk [vmem:[#allocation4 + $0x18] sm:$0xf] %vm932_vm5, %v1049_v16 }
 0x1fe   : > { %v1027_v17 = vpop.permute.xlu1 %1026  ;;  %v1155_v22 = vld [vmem:[#allocation4] sm:$0xff] }
 0x1ff   : > { %1029 = vst.msk [vmem:[#allocation4 + $0x8] sm:$0xf0] %vm997_vm3, %v1027_v17 }
 0x200   : > { %v1055_v18 = vpop.permute.xlu0 %1054 }
 0x201   : > { %1057 = vst.msk [vmem:[#allocation4 + $0x18] sm:$0xf] %vm940_vm6, %v1055_v18 }
 0x202   : > { %v1035_v19 = vpop.permute.xlu1 %1034 }
 0x203   : > { %1037 = vst.msk [vmem:[#allocation4 + $0x8] sm:$0xf0] %vm1006_vm4, %v1035_v19 }
 0x208   : > { %v1072_v20 = vpop.permute.xlu0 %1071 }
 0x209   : > { %1074 = vst.msk [vmem:[#allocation4 + $0x20] sm:$0xf] %vm932_vm5, %v1072_v20  ;;  %vm1771_vm5 = vmmov 0  }
 0x20a   : > { %v1156_v21 = vld [vmem:[#allocation4 + $0x8] sm:$0xff] }
 0x20b   : > { %1267 = vmatprep.mubr.f32.mxu1 %v1156_v21 }
 0x20c   : > { %1268 = vmatmul.mubr.f32.vlgmr.msra.gmra.mxu1 %v1155_v22 }
 0x20d   : > { %1724 = vmatpush3.msra.mxu1 %v1196_v63 }
 0x20e   : > { %1725 = vmatprep.subr.mxu1 %v1195_v23 }
 0x20f   : > { %1726 = vmatpush3.msra.mxu1 %v1195_v23 }
 0x210   : > { %1727 = vmatprep.subr.mxu1 %v1194_v24 }
 0x211   : > { %1728 = vmatpush3.msra.mxu1 %v1194_v24 }
 0x212   : > { %1729 = vmatprep.subr.mxu1 %v1193_v25 }
 0x213   : > { %1730 = vmatpush3.msra.mxu1 %v1193_v25 }
 0x214   : > { %v1079_v26 = vpop.permute.xlu1 %1078  ;;  %1734 = vmatprep.subr.mxu1 %v1770_v44 }
 0x215   : > { %1081 = vst.msk [vmem:[#allocation4 + $0x20] sm:$0xf] %vm940_vm6, %v1079_v26 }
 0x216   : > { %v1101_v27 = vpop.permute.xlu0 %1100 }
 0x217   : > { %1103 = vst.msk [vmem:[#allocation4 + $0x18] sm:$0xf0] %vm989_vm2, %v1101_v27 }
 0x218   : > { %v1086_v28 = vpop.permute.xlu1 %1085 }
 0x219   : > { %1088 = vst.msk [vmem:[#allocation4 + $0x20] sm:$0xf] %vm948_vm1, %v1086_v28 }
 0x21a   : > { %v1108_v29 = vpop.permute.xlu0 %1107 }
 0x21b   : > { %1110 = vst.msk [vmem:[#allocation4 + $0x18] sm:$0xf0] %vm997_vm3, %v1108_v29 }
 0x21e   : > { %v1062_v30 = vpop.permute.xlu0 %1061 }
 0x21f   : > { %1064 = vst.msk [vmem:[#allocation4 + $0x18] sm:$0xf] %vm948_vm1, %v1062_v30 }
 0x222   : > { %v1130_v31 = vpop.permute.xlu1 %1129 }
 0x223   : > { %1132 = vst.msk [vmem:[#allocation4 + $0x20] sm:$0xf0] %vm989_vm2, %v1130_v31 }
 0x22e   : > { %v1138_v32 = vpop.permute.xlu1 %1137 }
 0x22f   : > { %1140 = vst.msk [vmem:[#allocation4 + $0x20] sm:$0xf0] %vm997_vm3, %v1138_v32 }
 0x232   : > { %v1146_v33 = vpop.permute.xlu1 %1145 }
 0x233   : > { %1148 = vst.msk [vmem:[#allocation4 + $0x20] sm:$0xf0] %vm1006_vm4, %v1146_v33 }
 0x236   : > { %v1116_v34 = vpop.permute.xlu1 %1115 }
 0x237   : > { %1118 = vst.msk [vmem:[#allocation4 + $0x18] sm:$0xf0] %vm1006_vm4, %v1116_v34 }
 0x23a   : > { %v1159_v35 = vld [vmem:[#allocation4 + $0x20] sm:$0xff] }
 0x23b   : > { %1272 = vmatprep.mubr.f32.mxu1 %v1159_v35 }
 0x23e   : > { %v1158_v36 = vld [vmem:[#allocation4 + $0x18] sm:$0xff] }
 0x23f   : > { %1273 = vmatmul.mubr.f32.gmra.mxu1 %v1158_v36 }
 0x240   : > { %1731 = vmatprep.mubr.msk.f32.mxu1 %vm195_vm0, %v1157_v37 }
 0x243   : > { %1732 = vmatmul.mubr.msk.f32.vlgmr.msra.gmra.mxu1 %vm195_vm0, %v1160_v38 }
 0x244   : > { %1735 = vmatpush3.msra.mxu1 %v1372_v39  ;;  %1742 = vmatprep.mubr.msk.f32.mxu1 %vm1771_vm5, %v1770_v44 }
 0x245   : > { %1736 = vmatprep.subr.mxu1 %v1770_v44 }
 0x246   : > { %1737 = vmatpush3.msra.mxu1 %v1371_v40 }
 0x247   : > { %1738 = vmatprep.subr.mxu1 %v1770_v44 }
 0x248   : > { %1739 = vmatpush3.msra.mxu1 %v1370_v41 }
 0x249   : > { %1740 = vmatprep.subr.mxu1 %v1770_v44 }
 0x24a   : > { %1741 = vmatpush3.msra.mxu1 %v1369_v42 }
 0x2cc   : > { %v1686_v43 = vpop.f32.mrf.mxu1 }
 0x2ce   : > { %v1687_v45 = vpop.f32.mrf.mxu1 }
 0x2cf   : > { %v1688_v50 = vadd.f32 %v1687_v45, %v1686_v43 }
 0x2ff   : > { %v1689_v46 = vpop.f32.mrf.mxu1 }
 0x301   : > { %v1690_v47 = vpop.f32.mrf.mxu1 }
 0x302   : > { %v1691_v48 = vadd.f32 %v1690_v47, %v1689_v46 }
 0x303   : > { %v1733_v49 = vpop.f32.mrf.mxu1 }
 0x304   : > { %v1350_v51 = vadd.f32 %v1733_v49, %v1691_v48 }
 0x305   : > { %v1344_v52 = vpop.f32.mrf.mxu1 }
 0x306   : > { %vm1354_vm6 = vcmp.ge.f32.partialorder %v1350_v51, 0.0  ;;  %v1356_v53 = vmul.f32 0.2, %v1350_v51  ;;  %v1345_v54 = vadd.f32 %v1688_v50, %v1344_v52 }
 0x308   : > { %v1358_v55 = vsel %vm1354_vm6, %v1350_v51, %v1356_v53  ;;  %vm1353_vm7 = vcmp.ge.f32.partialorder %v1345_v54, 0.0  ;;  %v1355_v56 = vmul.f32 0.2, %v1345_v54 }
 0x309   : > { %v1360_v44 = vsel %vm195_vm0, %v1358_v55, 0.0 }
 0x30a   : > { %v1357_v57 = vsel %vm1353_vm7, %v1345_v54, %v1355_v56 }
 0x30b   : > { %v1359_v58 = vsel %vm195_vm0, %v1357_v57, 0.0 }
 0x30c   : > { %v1361_v59 = vadd.f32 %v1360_v44, %v1359_v58 }
 0x30e   : > { %v1362_v60 = vrot.slane %v1361_v59, 4 }
 0x310   : > { %v1363_v61 = vadd.f32 %v1362_v60, %v1361_v59 }
 0x312   : > { %v1364_v62 = vrot.slane %v1363_v61, 2 }
 0x314   : > { %v1365_v63 = vadd.f32 %v1364_v62, %v1363_v61 }
 0x316   : > { %v1366_v0 = vrot.slane %v1365_v63, 1 }
 0x318   : > { %v1367_v1 = vadd.f32 %v1366_v0, %v1365_v63 }
 0x31a   : > { %v1368_v2 = vmul.f32 0.0625, %v1367_v1 }
 0x31c   : > { %1743 = vmatmul.mubr.msk.f32.vlgmr.msra.gmra.mxu1 %vm195_vm0, %v1368_v2 }
 0x3dc   : > { %v1442_v3 = vpop.f32.mrf.mxu1 }
 0x3dd   : > { %v1446_v4 = vmul.f32 0.01, %v1442_v3 }
 0x3de   : > { %v1744_v5 = vpop.f32.mrf.mxu1 }
 0x3df   : > { %1448 = vst.msk [vmem:[%s193_s26] sm:$0x1] %vm1447_vm8, %v1446_v4 }
 0x3e0 PF: > { %s14_s15 = sadd.s32 1, %s1765_s15  }
 0x3e1   : > { %p11_p4 = scmp.ge.s32.totalorder %s14_s15, 4  }
 0x3e3   :  { %13 = sbr.rel (!%p11_p4) target bundleno = 1 (0x1), region = 142 }

</bundles_post_ra>
